<compile_context>
chip_gen: v7x
topology: tpu7x:2x2x1
jax: 0.10.0
libtpu: 0.0.40
codegen_flags: <defaults>
</compile_context>

<pallas_src>
import functools

import jax
import jax.numpy as jnp
from jax.experimental import pallas as pl
from jax.experimental.pallas import tpu as pltpu

DROPOUT_P = 0.2


def _round_up(x, m):
    return ((x + m - 1) // m) * m


def _vmem_budget_bytes():
    """~80% of physical VMEM (headroom for compiler scratch / semaphores)."""
    cap = 64 * 1024 * 1024
    try:
        cap = int(getattr(pltpu.get_tpu_info(), "vmem_capacity_bytes", cap))
    except Exception:
        pass
    return int(cap * 0.8)


def _dropout(y, seed_ref, dropout_p):
    # Inverted dropout; keep-decision stays in the uint32 integer domain.
    # TODO(synk): PyTorch's exact dropout RNG stream is not reproducible here;
    # the mask also depends on the row-tile size (program_id(0) is mixed in).
    pltpu.prng_seed(seed_ref[0] + pl.program_id(0))
    bits = pltpu.bitcast(pltpu.prng_random_bits(y.shape), jnp.uint32)
    # Overflow-safe threshold (would wrap to 0 for p -> 1.0 otherwise).
    threshold = jnp.uint32(min(int(round(dropout_p * 2.0 ** 32)), 2 ** 32 - 1))
    keep = bits >= threshold
    return jnp.where(keep, y * (1.0 / (1.0 - dropout_p)), 0.0)


def _ffn_kernel(seed_ref, x_ref, w1_ref, b1_ref, w2_ref, b2_ref, o_ref, *scratch,
                apply_dropout: bool, dropout_p: float, n_h_tiles: int):
    # MXU matmuls: bf16 inputs, f32 accumulation. x is cast to bf16 in-kernel.
    x_bf = x_ref[...].astype(jnp.bfloat16)
    h = jnp.dot(x_bf, w1_ref[...], preferred_element_type=jnp.float32)
    h = jnp.maximum(h + b1_ref[...], 0.0)                # bias + ReLU in f32 (VPU)
    part = jnp.dot(h.astype(jnp.bfloat16), w2_ref[...],
                   preferred_element_type=jnp.float32)

    def epilogue(y):
        y = y + b2_ref[...]
        if apply_dropout:
            y = _dropout(y, seed_ref, dropout_p)
        o_ref[...] = y.astype(o_ref.dtype)

    if n_h_tiles == 1:
        # Weights are VMEM-resident and there is no hidden-dim reduction:
        # store directly, no accumulator scratch at all.
        epilogue(part)
    else:
        acc_ref, = scratch
        hstep = pl.program_id(1)

        @pl.when(hstep == 0)
        def _():
            acc_ref[...] = part                          # write, not zero-init + RMW

        @pl.when(hstep != 0)
        def _():
            acc_ref[...] += part

        @pl.when(hstep == n_h_tiles - 1)
        def _():
            epilogue(acc_ref[...])


def _choose_hidden_tile(H, C, tm, budget):
    """Largest hidden tile (H itself if possible) whose VMEM footprint fits."""
    def footprint(th):
        w = 2 * (C * th * 2) * 2                  # W1 + W2 tiles, bf16, 2 bufs each
        act = 2 * (tm * C * 4) * 2                # x + out tiles, f32, 2 bufs each
        acc = 0 if th == H else tm * C * 4        # f32 accumulator scratch
        misc = (th + C) * 4 * 2 + (1 << 20)       # biases + slack
        return w + act + acc + misc

    if footprint(H) <= budget:
        return H                                  # weight-resident path
    best = None
    for th in range(128, H, 128):                 # largest 128-aligned divisor of H
        if H % th == 0 and footprint(th) <= budget:
            best = th
    if best is not None:
        return best
    for th in range(128, H + 1, 128):             # smallest legal tile as fallback
        if H % th == 0:
            return th
    return H                                      # H not 128-divisible: full dim


def feed_forward(x, w1, b1, w2, b2, *, seed=0, training=False, tm=256):
    """x: (B, T, C) f32; w1: (C, H); b1: (H,); w2: (H, C); b2: (C,) -> (B, T, C)."""
    B, T, C = x.shape
    H = w1.shape[1]                               # 4 * n_embed
    M = B * T
    out_dtype = x.dtype

    # Cast weights to bf16 only if the caller did not already do it at init.
    w1b = w1 if w1.dtype == jnp.bfloat16 else w1.astype(jnp.bfloat16)
    w2b = w2 if w2.dtype == jnp.bfloat16 else w2.astype(jnp.bfloat16)
    b1_2d = b1.reshape(1, H).astype(jnp.float32)
    b2_2d = b2.reshape(1, C).astype(jnp.float32)
    seed_arr = jnp.asarray([seed], dtype=jnp.int32)

    # Rows: pad only to the 8-sublane multiple (usually a no-op); the grid
    # uses cdiv with a partial last tile, so there is no pad-to-tile copy.
    x2d = x.reshape(M, C)
    M_pad = _round_up(M, 8)
    if M_pad != M:
        x2d = jnp.pad(x2d, ((0, M_pad - M), (0, 0)))
    tm_eff = min(tm, M_pad)
    n_row_tiles = pl.cdiv(M_pad, tm_eff)

    budget = _vmem_budget_bytes()
    th_eff = _choose_hidden_tile(H, C, tm_eff, budget)
    n_h_tiles = 1 if th_eff == H else H // th_eff

    kernel = functools.partial(_ffn_kernel, apply_dropout=training,
                               dropout_p=DROPOUT_P, n_h_tiles=n_h_tiles)

    weight_stream = 1 if n_h_tiles == 1 else n_row_tiles
    cost = pl.CostEstimate(
        flops=4 * M_pad * C * H,                          # 2 matmuls x 2*M*C*H
        transcendentals=0,
        bytes_accessed=(M_pad * C * 4                     # x read (f32)
                        + M_pad * C * 4                   # out write (f32)
                        + (w1b.size + w2b.size) * 2 * weight_stream
                        + (H + C) * 4),
    )

    if n_h_tiles == 1:
        # Weight-resident path: 1-D grid over row tiles; constant weight index
        # maps mean W1/W2 are DMA'd once and never re-fetched.
        grid = (n_row_tiles,)
        in_specs = [
            pl.BlockSpec((tm_eff, C), lambda i, s: (i, 0)),     # x tile (f32)
            pl.BlockSpec((C, H), lambda i, s: (0, 0)),          # W1 (resident)
            pl.BlockSpec((1, H), lambda i, s: (0, 0)),          # b1
            pl.BlockSpec((H, C), lambda i, s: (0, 0)),          # W2 (resident)
            pl.BlockSpec((1, C), lambda i, s: (0, 0)),          # b2
        ]
        out_specs = pl.BlockSpec((tm_eff, C), lambda i, s: (i, 0))
        scratch_shapes = []
        dim_sem = ("parallel",)
    else:
        # Streaming path: H tiled on the trailing reduction axis.
        grid = (n_row_tiles, n_h_tiles)
        in_specs = [
            pl.BlockSpec((tm_eff, C), lambda i, h, s: (i, 0)),
            pl.BlockSpec((C, th_eff), lambda i, h, s: (0, h)),
            pl.BlockSpec((1, th_eff), lambda i, h, s: (0, h)),
            pl.BlockSpec((th_eff, C), lambda i, h, s: (h, 0)),
            pl.BlockSpec((1, C), lambda i, h, s: (0, 0)),
        ]
        out_specs = pl.BlockSpec((tm_eff, C), lambda i, h, s: (i, 0))
        scratch_shapes = [pltpu.VMEM((tm_eff, C), jnp.float32)]
        dim_sem = ("parallel", "arbitrary")

    out2d = pl.pallas_call(
        kernel,
        out_shape=jax.ShapeDtypeStruct((M_pad, C), out_dtype),
        grid_spec=pltpu.PrefetchScalarGridSpec(
            num_scalar_prefetch=1,                        # seed lands in SMEM
            grid=grid,
            in_specs=in_specs,
            out_specs=out_specs,
            scratch_shapes=scratch_shapes),
        compiler_params=pltpu.CompilerParams(
            dimension_semantics=dim_sem,
            vmem_limit_bytes=budget),
        cost_estimate=cost,
    )(seed_arr, x2d, w1b, b1_2d, w2b, b2_2d)

    if M_pad != M:
        out2d = out2d[:M]
    return out2d.reshape(B, T, C)


def init_params(key, n_embed):
    """Deterministic init mirroring nn.Linear's shapes (uniform +/- 1/sqrt(fan_in))."""
    h = 4 * n_embed
    k1, k2, k3, k4 = jax.random.split(key, 4)
    bound1 = 1.0 / jnp.sqrt(n_embed)
    bound2 = 1.0 / jnp.sqrt(h)
    w1 = jax.random.uniform(k1, (n_embed, h), jnp.float32, -bound1, bound1)
    b1 = jax.random.uniform(k2, (h,), jnp.float32, -bound1, bound1)
    w2 = jax.random.uniform(k3, (h, n_embed), jnp.float32, -bound2, bound2)
    b2 = jax.random.uniform(k4, (n_embed,), jnp.float32, -bound2, bound2)
    return w1, b1, w2, b2


if __name__ == "__main__":
    # Small but MXU-friendly shapes: C = 256 matches the 256-wide MXU on
    # v6e/v7x; H = 4*C = 1024. Weights easily take the VMEM-resident path.
    B, T, n_embed = 2, 8, 256
    key = jax.random.PRNGKey(0)
    kx, kp = jax.random.split(key)
    x = jax.random.normal(kx, (B, T, n_embed), dtype=jnp.float32)
    w1, b1, w2, b2 = init_params(kp, n_embed)

    # Hoist the bf16 weight cast out of the per-call path (done once, at init).
    w1b = w1.astype(jnp.bfloat16)
    w2b = w2.astype(jnp.bfloat16)

    out = feed_forward(x, w1b, b1, w2b, b2, training=False)  # eval: dropout = identity
    out = jax.block_until_ready(out)

    # Pure-JAX reference mimicking the kernel's bf16-input / f32-accumulate path.
    hi = jax.lax.Precision.HIGHEST
    xb = x.reshape(-1, n_embed).astype(jnp.bfloat16).astype(jnp.float32)
    w1f = w1b.astype(jnp.float32)
    w2f = w2b.astype(jnp.float32)
    hid = jnp.maximum(jnp.dot(xb, w1f, precision=hi) + b1, 0.0)
    hid = hid.astype(jnp.bfloat16).astype(jnp.float32)
    ref = (jnp.dot(hid, w2f, precision=hi) + b2).reshape(B, T, n_embed)

    assert out.shape == (B, T, n_embed)
    assert jnp.allclose(out, ref, atol=1e-2, rtol=1e-2)

    print("KERNEL_OK")
</pallas_src>

<mosaic_0001>
module attributes {stable_mosaic.version = 11 : i64} {
  func.func @_ffn_kernel(%arg0: i32, %arg1: memref<1xi32, #tpu.memory_space<smem>>, %arg2: memref<16x256xf32, #tpu.memory_space<vmem>>, %arg3: memref<256x1024xbf16, #tpu.memory_space<vmem>>, %arg4: memref<1x1024xf32, #tpu.memory_space<vmem>>, %arg5: memref<1024x256xbf16, #tpu.memory_space<vmem>>, %arg6: memref<1x256xf32, #tpu.memory_space<vmem>>, %arg7: memref<16x256xf32, #tpu.memory_space<vmem>>) attributes {dimension_semantics = [#tpu.dimension_semantics<parallel>], iteration_bounds = array<i64: 1>, scalar_prefetch = 1 : i64, scratch_operands = 0 : i64, tpu.core_type = #tpu.core_type<tc>, window_params = [{transform_indices = @transform_0, window_bounds = array<i64: 16, 256>}, {pipeline_mode = #tpu.pipeline_mode<synchronous>, transform_indices = @transform_1, window_bounds = array<i64: 256, 1024>}, {pipeline_mode = #tpu.pipeline_mode<synchronous>, transform_indices = @transform_2, window_bounds = array<i64: 1, 1024>}, {pipeline_mode = #tpu.pipeline_mode<synchronous>, transform_indices = @transform_3, window_bounds = array<i64: 1024, 256>}, {pipeline_mode = #tpu.pipeline_mode<synchronous>, transform_indices = @transform_4, window_bounds = array<i64: 1, 256>}, {transform_indices = @transform_5, window_bounds = array<i64: 16, 256>}]} {
    %c0 = arith.constant 0 : index
    %c0_0 = arith.constant 0 : index
    %0 = vector.load %arg2[%c0, %c0_0] : memref<16x256xf32, #tpu.memory_space<vmem>>, vector<16x256xf32>
    %1 = arith.truncf %0 : vector<16x256xf32> to vector<16x256xbf16>
    %c0_1 = arith.constant 0 : index
    %c0_2 = arith.constant 0 : index
    %2 = vector.load %arg3[%c0_1, %c0_2] : memref<256x1024xbf16, #tpu.memory_space<vmem>>, vector<256x1024xbf16>
    %cst = arith.constant dense<0.000000e+00> : vector<16x1024xf32>
    %3 = tpu.matmul %1, %2, %cst {dimension_numbers = #tpu.dot_dimension_numbers<[1], [0], [0], [1], [0, 0, 1, 1], [], []>} : vector<16x256xbf16>, vector<256x1024xbf16>, vector<16x1024xf32> -> vector<16x1024xf32>
    %c0_3 = arith.constant 0 : index
    %c0_4 = arith.constant 0 : index
    %4 = vector.load %arg4[%c0_3, %c0_4] : memref<1x1024xf32, #tpu.memory_space<vmem>>, vector<1x1024xf32>
    %5 = vector.broadcast %4 : vector<1x1024xf32> to vector<16x1024xf32>
    %6 = arith.addf %3, %5 : vector<16x1024xf32>
    %cst_5 = arith.constant 0.000000e+00 : f32
    %7 = vector.broadcast %cst_5 : f32 to vector<16x1024xf32>
    %8 = arith.maximumf %6, %7 : vector<16x1024xf32>
    %9 = arith.truncf %8 : vector<16x1024xf32> to vector<16x1024xbf16>
    %c0_6 = arith.constant 0 : index
    %c0_7 = arith.constant 0 : index
    %10 = vector.load %arg5[%c0_6, %c0_7] : memref<1024x256xbf16, #tpu.memory_space<vmem>>, vector<1024x256xbf16>
    %cst_8 = arith.constant dense<0.000000e+00> : vector<16x256xf32>
    %11 = tpu.matmul %9, %10, %cst_8 {dimension_numbers = #tpu.dot_dimension_numbers<[1], [0], [0], [1], [0, 0, 1, 1], [], []>} : vector<16x1024xbf16>, vector<1024x256xbf16>, vector<16x256xf32> -> vector<16x256xf32>
    %c0_9 = arith.constant 0 : index
    %c0_10 = arith.constant 0 : index
    %12 = vector.load %arg6[%c0_9, %c0_10] : memref<1x256xf32, #tpu.memory_space<vmem>>, vector<1x256xf32>
    %13 = vector.broadcast %12 : vector<1x256xf32> to vector<16x256xf32>
    %14 = arith.addf %11, %13 : vector<16x256xf32>
    %c0_11 = arith.constant 0 : index
    %c0_12 = arith.constant 0 : index
    %15 = vector.load %arg7[%c0_11, %c0_12] : memref<16x256xf32, #tpu.memory_space<vmem>>, vector<16x256xf32>
    tpu.vector_store %arg7[%c0_11, %c0_12], %14 {strides = array<i32>} : memref<16x256xf32, #tpu.memory_space<vmem>>, vector<16x256xf32>,
    return
  }
  func.func @transform_0(%arg0: i32, %arg1: memref<1xi32, #tpu.memory_space<smem>>) -> (i32, i32) {
    %c0_i32 = arith.constant 0 : i32
    %c0_i32_0 = arith.constant 0 : i32
    return %arg0, %c0_i32 : i32, i32
  }
  func.func @transform_1(%arg0: i32, %arg1: memref<1xi32, #tpu.memory_space<smem>>) -> (i32, i32) {
    %c0_i32 = arith.constant 0 : i32
    %c0_i32_0 = arith.constant 0 : i32
    %c0_i32_1 = arith.constant 0 : i32
    return %c0_i32, %c0_i32_0 : i32, i32
  }
  func.func @transform_2(%arg0: i32, %arg1: memref<1xi32, #tpu.memory_space<smem>>) -> (i32, i32) {
    %c0_i32 = arith.constant 0 : i32
    %c0_i32_0 = arith.constant 0 : i32
    %c0_i32_1 = arith.constant 0 : i32
    return %c0_i32, %c0_i32_0 : i32, i32
  }
  func.func @transform_3(%arg0: i32, %arg1: memref<1xi32, #tpu.memory_space<smem>>) -> (i32, i32) {
    %c0_i32 = arith.constant 0 : i32
    %c0_i32_0 = arith.constant 0 : i32
    %c0_i32_1 = arith.constant 0 : i32
    return %c0_i32, %c0_i32_0 : i32, i32
  }
  func.func @transform_4(%arg0: i32, %arg1: memref<1xi32, #tpu.memory_space<smem>>) -> (i32, i32) {
    %c0_i32 = arith.constant 0 : i32
    %c0_i32_0 = arith.constant 0 : i32
    %c0_i32_1 = arith.constant 0 : i32
    return %c0_i32, %c0_i32_0 : i32, i32
  }
  func.func @transform_5(%arg0: i32, %arg1: memref<1xi32, #tpu.memory_space<smem>>) -> (i32, i32) {
    %c0_i32 = arith.constant 0 : i32
    %c0_i32_0 = arith.constant 0 : i32
    return %arg0, %c0_i32 : i32, i32
  }
}

</mosaic_0001>

<bundles_post_ra>
// kernel: tpu_custom_call.1
= control target key start
LH: loop header
LB: loop body
LE: loop exit
PB: predicated region body
PF: predicated region fallthrough
CT: control target
= control target key end

     0   :  { %12 = vsyncpa [#allocation5], 0  ;;  %s2763_s0 = inlined_call_operand.<no memory space> [shape: s32[1], index: 0, kind: input, shape index: {}]   ;;  %s2764_s1 = inlined_call_operand.hbm [shape: f32[16,256], index: 1, kind: input, shape index: {}]   ;;  %s2765_s2 = inlined_call_operand.hbm [shape: bf16[256,1024], index: 2, kind: input, shape index: {}]   ;;  %s2766_s3 = inlined_call_operand.vmem [shape: f32[1,1024], index: 3, kind: input, shape index: {}]   ;;  %s2767_s4 = inlined_call_operand.hbm [shape: bf16[1024,256], index: 4, kind: input, shape index: {}]   ;;  %s2768_s5 = inlined_call_operand.vmem [shape: f32[1,256], index: 5, kind: input, shape index: {}]   ;;  %s2769_s6 = inlined_call_operand.hbm [shape: f32[16,256], index: 6, kind: output, shape index: {}]  }
   0x1   :  { %13 = vsyncpa [#allocation8], 0 }
   0x2   :  { %14 = vsyncpa [#allocation6], 0  ;;  %s2618_s0 = smov [#allocation7]   ;;  %s2524_s24 = scalar_lea.hbm %s2765_s2, 16384 }
   0x3   :  { %s32_s21 = sshll.u32 %s2618_s0, 4  ;;  %p2525_p0 = scmp.ne.s32.totalorder %s2765_s2, %s2524_s24  ;;  %s33_s21 = int_to_ptr.vmem [resolvable:$true] %s32_s21 }
   0x4   :  { %p2528_p1 = scmp.lt.u32.totalorder %s2524_s24, %s2765_s2 }
   0x6   :  { %p2530_p2 = pnand %p2528_p1, %p2525_p0 }
   0x8   :  { %2533 = shalt.err (!%p2530_p2)
}
   0x9   :  { %s2534_s29 = scalar_lea.vmem %s33_s21, 16384  ;;  %p2539_p4 = scmp.lt.s32.totalorder %s33_s21, %s33_s21 }
   0xa   :  { %p2535_p3 = scmp.ne.s32.totalorder %s33_s21, %s2534_s29  ;;  %p2540_p5 = scmp.lt.s32.totalorder %s2534_s29, %s2534_s29 }
   0xc   :  { %p2541_p6 = por %p2540_p5, %p2539_p4 }
   0xe   :  { %p2542_p7 = pnand %p2541_p6, %p2535_p3 }
  0x10   :  { %2545 = shalt.err (!%p2542_p7)
}
  0x11   :  { %s2619_s30 = smov 512   ;;  %s2620_s7 = smov 32  }
  0x12   :  { %38 = dma.hbm_to_vmem [thread:$0]  %s2765_s2, 16384, %s33_s21, [#allocation8], %s2619_s30, %s2619_s30, %s2620_s7  }
  0x13   :  { %s2621_s10 = smov [#allocation4]   ;;  %s2546_s14 = scalar_lea.hbm %s2764_s1, 512 }
  0x14   :  { %s20_s11 = sshll.u32 %s2621_s10, 4  ;;  %p2547_p8 = scmp.ne.s32.totalorder %s2764_s1, %s2546_s14  ;;  %s21_s11 = int_to_ptr.vmem [resolvable:$true] %s20_s11 }
  0x15   :  { %p2550_p9 = scmp.lt.u32.totalorder %s2546_s14, %s2764_s1 }
  0x17   :  { %p2552_p10 = pnand %p2550_p9, %p2547_p8 }
  0x19   :  { %2555 = shalt.err (!%p2552_p10)
}
  0x1a   :  { %s2556_s19 = scalar_lea.vmem %s21_s11, 512  ;;  %p2561_p12 = scmp.lt.s32.totalorder %s21_s11, %s21_s11 }
  0x1b   :  { %p2557_p11 = scmp.ne.s32.totalorder %s21_s11, %s2556_s19  ;;  %p2562_p13 = scmp.lt.s32.totalorder %s2556_s19, %s2556_s19 }
  0x1d   :  { %p2563_p0 = por %p2562_p13, %p2561_p12 }
  0x1f   :  { %p2564_p1 = pnand %p2563_p0, %p2557_p11 }
  0x21   :  { %2567 = shalt.err (!%p2564_p1)
}
  0x22   :  { %s2622_s2 = smov 256   ;;  %s2623_s20 = smov 16  }
  0x23   :  { %26 = dma.hbm_to_vmem [thread:$0]  %s2764_s1, 512, %s21_s11, [#allocation5], %s2622_s2, %s2622_s2, %s2623_s20  }
  0x24   :  { %s2624_s22 = smov [#allocation9]   ;;  %s2568_s26 = scalar_lea.hbm %s2767_s4, 16384 }
  0x25   :  { %s46_s23 = sshll.u32 %s2624_s22, 4  ;;  %p2569_p2 = scmp.ne.s32.totalorder %s2767_s4, %s2568_s26  ;;  %s47_s23 = int_to_ptr.vmem [resolvable:$true] %s46_s23 }
  0x26   :  { %p2572_p3 = scmp.lt.u32.totalorder %s2568_s26, %s2767_s4 }
  0x28   :  { %p2574_p4 = pnand %p2572_p3, %p2569_p2 }
  0x2a   :  { %2577 = shalt.err (!%p2574_p4)
}
  0x2b   :  { %s2578_s7 = scalar_lea.vmem %s47_s23, 16384  ;;  %p2583_p6 = scmp.lt.s32.totalorder %s47_s23, %s47_s23 }
  0x2c   :  { %p2579_p5 = scmp.ne.s32.totalorder %s47_s23, %s2578_s7  ;;  %p2584_p7 = scmp.lt.s32.totalorder %s2578_s7, %s2578_s7 }
  0x2e   :  { %p2585_p8 = por %p2584_p7, %p2583_p6 }
  0x30   :  { %p2586_p9 = pnand %p2585_p8, %p2579_p5 }
  0x32   :  { %2589 = shalt.err (!%p2586_p9)
}
  0x33   :  { %s2625_s1 = smov 128   ;;  %s2626_s8 = smov 8  }
  0x34   :  { %52 = dma.hbm_to_vmem [thread:$0]  %s2767_s4, 16384, %s47_s23, [#allocation8], %s2625_s1, %s2625_s1, %s2626_s8  }
  0x35   :  { %2612 = dma.done.wait [#allocation5], 512  }
  0x36   :  { %2613 = vsyncadd [#allocation5], 4294966784 }
  0x37   :  { %2614 = dma.done.wait [#allocation8], 32768  }
  0x38   :  { %2615 = vsyncadd [#allocation8], 4294934528  ;;  %v70_v0 = vld [vmem:[#allocation7] sm:$0xff]  ;;  %v65_v17 = vld [vmem:[#allocation4 + $0x8] sm:$0xff]  ;;  %s2627_s13 = smov [#allocation10]  }
  0x39   :  { %v74_v1 = vld [vmem:[#allocation7 + $0x20] sm:$0xff]  ;;  %v67_v18 = vld [vmem:[#allocation4 + $0x18] sm:$0xff]  ;;  %s2037_s14 = sshll.u32 %s2627_s13, 4  ;;  %s2038_s14 = int_to_ptr.vmem [resolvable:$true] %s2037_s14 }
  0x3a   :  { %v78_v2 = vld [vmem:[#allocation7 + $0x40] sm:$0xff]  ;;  %v2051_v3 = vcombine.high %v70_v0, %v74_v1  ;;  %v2050_v4 = vcombine.low %v70_v0, %v74_v1  ;;  %v2702_v20 = vpack.c.bf16 %v67_v18, %v65_v17  ;;  %v71_v1 = vld [vmem:[#allocation7 + $0x8] sm:$0xff]  ;;  %p2595_p11 = scmp.lt.s32.totalorder %s2038_s14, %s2038_s14 }
  0x3b   :  { %v82_v5 = vld [vmem:[#allocation7 + $0x60] sm:$0xff]  ;;  %v99_v17 = vld [vmem:[#allocation7 + $0xe8] sm:$0xff] }
  0x3c   :  { %v2059_v6 = vcombine.high %v78_v2, %v82_v5  ;;  %v86_v7 = vld [vmem:[#allocation7 + $0x80] sm:$0xff]  ;;  %880 = vmatprep.subr.bf16.mxu1 %v2051_v3  ;;  %v2058_v9 = vcombine.low %v78_v2, %v82_v5  ;;  %912 = vmatprep.mubr.bf16.mxu1 %v2702_v20  ;;  %v75_v2 = vld [vmem:[#allocation7 + $0x28] sm:$0xff]  ;;  %v66_v5 = vld [vmem:[#allocation4 + $0x10] sm:$0xff] }
  0x3d   :  { %v90_v8 = vld [vmem:[#allocation7 + $0xa0] sm:$0xff]  ;;  %881 = vmatpush1.bf16.msra.mxu1 %v2050_v4 }
  0x3e   :  { %882 = vmatprep.subr.bf16.mxu1 %v2059_v6  ;;  %v2067_v10 = vcombine.high %v86_v7, %v90_v8  ;;  %v94_v11 = vld [vmem:[#allocation7 + $0xc0] sm:$0xff]  ;;  %v2066_v13 = vcombine.low %v86_v7, %v90_v8  ;;  %v79_v7 = vld [vmem:[#allocation7 + $0x48] sm:$0xff] }
  0x3f   :  { %v98_v12 = vld [vmem:[#allocation7 + $0xe0] sm:$0xff]  ;;  %v83_v8 = vld [vmem:[#allocation7 + $0x68] sm:$0xff] }
  0x40   :  { %v2075_v14 = vcombine.high %v94_v11, %v98_v12  ;;  %v102_v15 = vld [vmem:[#allocation7 + $0x100] sm:$0xff]  ;;  %v2074_v19 = vcombine.low %v94_v11, %v98_v12  ;;  %v2052_v11 = vcombine.low %v71_v1, %v75_v2  ;;  %v87_v12 = vld [vmem:[#allocation7 + $0x88] sm:$0xff] }
  0x41   :  { %883 = vmatpush1.bf16.msra.mxu1 %v2058_v9  ;;  %v106_v16 = vld [vmem:[#allocation7 + $0x120] sm:$0xff]  ;;  %v2053_v9 = vcombine.high %v71_v1, %v75_v2  ;;  %v175_v2 = vld [vmem:[#allocation7 + $0x348] sm:$0xff] }
  0x42   :  { %884 = vmatprep.subr.bf16.mxu1 %v2067_v10  ;;  %v2083_v21 = vcombine.high %v102_v15, %v106_v16  ;;  %v110_v22 = vld [vmem:[#allocation7 + $0x140] sm:$0xff]  ;;  %v2082_v24 = vcombine.low %v102_v15, %v106_v16  ;;  %v2060_v15 = vcombine.low %v79_v7, %v83_v8  ;;  %v95_v16 = vld [vmem:[#allocation7 + $0xc8] sm:$0xff] }
  0x43   :  { %v114_v23 = vld [vmem:[#allocation7 + $0x160] sm:$0xff] }
  0x44   :  { %v2091_v25 = vcombine.high %v110_v22, %v114_v23  ;;  %v118_v26 = vld [vmem:[#allocation7 + $0x180] sm:$0xff]  ;;  %v2090_v28 = vcombine.low %v110_v22, %v114_v23  ;;  %v107_v22 = vld [vmem:[#allocation7 + $0x128] sm:$0xff]  ;;  %v2077_v23 = vcombine.high %v95_v16, %v99_v17 }
  0x45   :  { %885 = vmatpush1.bf16.msra.mxu1 %v2066_v13  ;;  %v122_v27 = vld [vmem:[#allocation7 + $0x1a0] sm:$0xff]  ;;  %v91_v13 = vld [vmem:[#allocation7 + $0xa8] sm:$0xff] }
  0x46   :  { %886 = vmatprep.subr.bf16.mxu1 %v2075_v14  ;;  %v2099_v29 = vcombine.high %v118_v26, %v122_v27  ;;  %v126_v30 = vld [vmem:[#allocation7 + $0x1c0] sm:$0xff]  ;;  %v2098_v32 = vcombine.low %v118_v26, %v122_v27  ;;  %v2061_v14 = vcombine.high %v79_v7, %v83_v8  ;;  %v2069_v18 = vcombine.high %v87_v12, %v91_v13  ;;  %v115_v27 = vld [vmem:[#allocation7 + $0x168] sm:$0xff] }
  0x47   :  { %v130_v31 = vld [vmem:[#allocation7 + $0x1e0] sm:$0xff]  ;;  %v183_v8 = vld [vmem:[#allocation7 + $0x388] sm:$0xff] }
  0x48   :  { %v2107_v33 = vcombine.high %v126_v30, %v130_v31  ;;  %v134_v34 = vld [vmem:[#allocation7 + $0x200] sm:$0xff]  ;;  %v2106_v36 = vcombine.low %v126_v30, %v130_v31  ;;  %v119_v30 = vld [vmem:[#allocation7 + $0x188] sm:$0xff] }
  0x49   :  { %887 = vmatpush1.bf16.msra.mxu1 %v2074_v19  ;;  %v138_v35 = vld [vmem:[#allocation7 + $0x220] sm:$0xff]  ;;  %v2068_v19 = vcombine.low %v87_v12, %v91_v13  ;;  %v123_v31 = vld [vmem:[#allocation7 + $0x1a8] sm:$0xff]  ;;  %v2349_v13 = vld [vmem:[#allocation9 + $0x50] ss:$8 sps:$4 sm:$0xff]  }
  0x4a   :  { %888 = vmatprep.subr.bf16.mxu1 %v2083_v21  ;;  %v142_v37 = vld [vmem:[#allocation7 + $0x240] sm:$0xff]  ;;  %v2115_v39 = vcombine.high %v134_v34, %v138_v35  ;;  %v2114_v40 = vcombine.low %v134_v34, %v138_v35  ;;  %v103_v21 = vld [vmem:[#allocation7 + $0x108] sm:$0xff] }
  0x4b   :  { %v146_v38 = vld [vmem:[#allocation7 + $0x260] sm:$0xff]  ;;  %v2085_v26 = vcombine.high %v103_v21, %v107_v22  ;;  %v127_v34 = vld [vmem:[#allocation7 + $0x1c8] sm:$0xff] }
  0x4c   :  { %v150_v41 = vld [vmem:[#allocation7 + $0x280] sm:$0xff]  ;;  %v2123_v43 = vcombine.high %v142_v37, %v146_v38  ;;  %v2122_v44 = vcombine.low %v142_v37, %v146_v38  ;;  %v131_v35 = vld [vmem:[#allocation7 + $0x1e8] sm:$0xff] }
  0x4d   :  { %889 = vmatpush1.bf16.msra.mxu1 %v2082_v24  ;;  %v154_v42 = vld [vmem:[#allocation7 + $0x2a0] sm:$0xff]  ;;  %v2076_v24 = vcombine.low %v95_v16, %v99_v17  ;;  %v2109_v37 = vcombine.high %v127_v34, %v131_v35  ;;  %v135_v38 = vld [vmem:[#allocation7 + $0x208] sm:$0xff] }
  0x4e   :  { %890 = vmatprep.subr.bf16.mxu1 %v2091_v25  ;;  %v158_v45 = vld [vmem:[#allocation7 + $0x2c0] sm:$0xff]  ;;  %v2131_v47 = vcombine.high %v150_v41, %v154_v42  ;;  %v2130_v48 = vcombine.low %v150_v41, %v154_v42  ;;  %v111_v25 = vld [vmem:[#allocation7 + $0x148] sm:$0xff] }
  0x4f   :  { %v162_v46 = vld [vmem:[#allocation7 + $0x2e0] sm:$0xff]  ;;  %v143_v42 = vld [vmem:[#allocation7 + $0x248] sm:$0xff] }
  0x50   :  { %v166_v49 = vld [vmem:[#allocation7 + $0x300] sm:$0xff]  ;;  %v2139_v51 = vcombine.high %v158_v45, %v162_v46  ;;  %v2138_v52 = vcombine.low %v158_v45, %v162_v46  ;;  %v195_v16 = vld [vmem:[#allocation7 + $0x3e8] sm:$0xff] }
  0x51   :  { %891 = vmatpush1.bf16.msra.mxu1 %v2090_v28  ;;  %v170_v50 = vld [vmem:[#allocation7 + $0x320] sm:$0xff]  ;;  %v2084_v28 = vcombine.low %v103_v21, %v107_v22  ;;  %v72_v22 = vld [vmem:[#allocation7 + $0x10] sm:$0xff] }
  0x52   :  { %892 = vmatprep.subr.bf16.mxu1 %v2099_v29  ;;  %v174_v53 = vld [vmem:[#allocation7 + $0x340] sm:$0xff]  ;;  %v2147_v55 = vcombine.high %v166_v49, %v170_v50  ;;  %v2146_v56 = vcombine.low %v166_v49, %v170_v50  ;;  %v2093_v29 = vcombine.high %v111_v25, %v115_v27  ;;  %v155_v49 = vld [vmem:[#allocation7 + $0x2a8] sm:$0xff]  ;;  %v2335_v50 = vld [vmem:[#allocation9 + $0x14] ss:$8 sps:$4 sm:$0xff]  }
  0x53   :  { %v178_v54 = vld [vmem:[#allocation7 + $0x360] sm:$0xff] }
  0x54   :  { %v182_v57 = vld [vmem:[#allocation7 + $0x380] sm:$0xff]  ;;  %v2155_v59 = vcombine.high %v174_v53, %v178_v54  ;;  %v2154_v60 = vcombine.low %v174_v53, %v178_v54  ;;  %v159_v54 = vld [vmem:[#allocation7 + $0x2c8] sm:$0xff] }
  0x55   :  { %893 = vmatpush1.bf16.msra.mxu1 %v2098_v32  ;;  %v186_v58 = vld [vmem:[#allocation7 + $0x3a0] sm:$0xff]  ;;  %v2092_v32 = vcombine.low %v111_v25, %v115_v27 }
  0x56   :  { %894 = vmatprep.subr.bf16.mxu1 %v2107_v33  ;;  %v190_v61 = vld [vmem:[#allocation7 + $0x3c0] sm:$0xff]  ;;  %v2163_v63 = vcombine.high %v182_v57, %v186_v58  ;;  %v2162_v0 = vcombine.low %v182_v57, %v186_v58  ;;  %v2101_v33 = vcombine.high %v119_v30, %v123_v31 }
  0x57   :  { %v194_v62 = vld [vmem:[#allocation7 + $0x3e0] sm:$0xff] }
  0x58   :  { %v2171_v3 = vcombine.high %v190_v61, %v194_v62  ;;  %v64_v4 = vld [vmem:[#allocation4] sm:$0xff]  ;;  %v2170_v6 = vcombine.low %v190_v61, %v194_v62  ;;  %v171_v61 = vld [vmem:[#allocation7 + $0x328] sm:$0xff]  ;;  %v2341_v62 = vld [vmem:[#allocation9 + $0x34] ss:$8 sps:$4 sm:$0xff]  }
  0x59   :  { %895 = vmatpush1.bf16.msra.mxu1 %v2106_v36  ;;  %v2705_v10 = vpack.c.bf16 %v66_v5, %v64_v4  ;;  %v2100_v36 = vcombine.low %v119_v30, %v123_v31  ;;  %v2334_v46 = vld [vmem:[#allocation9] ss:$8 sps:$4 sm:$0xff]   ;;  %v2344_v4 = vld [vmem:[#allocation9 + $0x44] ss:$8 sps:$4 sm:$0xff]  }
  0x5a   :  { %896 = vmatprep.subr.bf16.mxu1 %v2115_v39  ;;  %v139_v39 = vld [vmem:[#allocation7 + $0x228] sm:$0xff] }
  0x5b   :  { %v2117_v41 = vcombine.high %v135_v38, %v139_v39  ;;  %v2116_v45 = vcombine.low %v135_v38, %v139_v39  ;;  %v2340_v58 = vld [vmem:[#allocation9 + $0x20] ss:$8 sps:$4 sm:$0xff]   ;;  %v2350_v17 = vld [vmem:[#allocation9 + $0x64] ss:$8 sps:$4 sm:$0xff]  }
  0x5c   :  { %v2356_v30 = vld [vmem:[#allocation9 + $0x84] ss:$8 sps:$4 sm:$0xff]  }
  0x5d   :  { %897 = vmatpush1.bf16.msra.mxu1 %v2114_v40  ;;  %v2108_v40 = vcombine.low %v127_v34, %v131_v35  ;;  %v88_v34 = vld [vmem:[#allocation7 + $0x90] sm:$0xff]  ;;  %v2362_v38 = vld [vmem:[#allocation9 + $0xa4] ss:$8 sps:$4 sm:$0xff]  }
  0x5e   :  { %898 = vmatprep.subr.bf16.mxu1 %v2123_v43  ;;  %v147_v43 = vld [vmem:[#allocation7 + $0x268] sm:$0xff]  ;;  %v92_v35 = vld [vmem:[#allocation7 + $0xb0] sm:$0xff] }
  0x61   :  { %899 = vmatpush1.bf16.msra.mxu1 %v2122_v44  ;;  %v2332_v44 = vld [vmem:[#allocation9 + $0x4] ss:$8 sps:$4 sm:$0xff]  }
  0x62   :  { %900 = vmatprep.subr.bf16.mxu1 %v2131_v47  ;;  %v2125_v47 = vcombine.high %v143_v42, %v147_v43  ;;  %1856 = vmatprep.subr.bf16.mxu0 %v2332_v44  ;;  %v2365_v44 = vld [vmem:[#allocation9 + $0xb4] ss:$8 sps:$4 sm:$0xff]  }
  0x63   :  { %1857 = vmatpush1.bf16.msra.mxu0 %v2334_v46 }
  0x64   :  { %1858 = vmatprep.subr.bf16.mxu0 %v2335_v50  ;;  %v2368_v50 = vld [vmem:[#allocation9 + $0xc4] ss:$8 sps:$4 sm:$0xff]  }
  0x65   :  { %901 = vmatpush1.bf16.msra.mxu1 %v2130_v48  ;;  %v151_v48 = vld [vmem:[#allocation7 + $0x288] sm:$0xff] }
  0x66   :  { %902 = vmatprep.subr.bf16.mxu1 %v2139_v51  ;;  %v2124_v51 = vcombine.low %v143_v42, %v147_v43  ;;  %v2133_v53 = vcombine.high %v151_v48, %v155_v49  ;;  %v2132_v57 = vcombine.low %v151_v48, %v155_v49  ;;  %v100_v42 = vld [vmem:[#allocation7 + $0xf0] sm:$0xff]  ;;  %v2364_v43 = vld [vmem:[#allocation9 + $0xa0] ss:$8 sps:$4 sm:$0xff]  }
  0x67   :  { %v108_v48 = vld [vmem:[#allocation7 + $0x130] sm:$0xff] }
  0x68   :  { %v2367_v49 = vld [vmem:[#allocation9 + $0xb0] ss:$8 sps:$4 sm:$0xff]  }
  0x69   :  { %903 = vmatpush1.bf16.msra.mxu1 %v2138_v52  ;;  %v2337_v52 = vld [vmem:[#allocation9 + $0x10] ss:$8 sps:$4 sm:$0xff]  }
  0x6a   :  { %904 = vmatprep.subr.bf16.mxu1 %v2147_v55  ;;  %v163_v55 = vld [vmem:[#allocation7 + $0x2e8] sm:$0xff]  ;;  %1859 = vmatpush1.bf16.msra.mxu0 %v2337_v52 }
  0x6d   :  { %905 = vmatpush1.bf16.msra.mxu1 %v2146_v56  ;;  %v2338_v56 = vld [vmem:[#allocation9 + $0x24] ss:$8 sps:$4 sm:$0xff]  }
  0x6e   :  { %906 = vmatprep.subr.bf16.mxu1 %v2155_v59  ;;  %v2141_v59 = vcombine.high %v159_v54, %v163_v55  ;;  %1860 = vmatprep.subr.bf16.mxu0 %v2338_v56  ;;  %v2371_v56 = vld [vmem:[#allocation9 + $0xd4] ss:$8 sps:$4 sm:$0xff]  }
  0x6f   :  { %1861 = vmatpush1.bf16.msra.mxu0 %v2340_v58 }
  0x70   :  { %1862 = vmatprep.subr.bf16.mxu0 %v2341_v62  ;;  %v2373_v62 = vld [vmem:[#allocation9 + $0xd0] ss:$8 sps:$4 sm:$0xff]  }
  0x71   :  { %907 = vmatpush1.bf16.msra.mxu1 %v2154_v60  ;;  %v167_v60 = vld [vmem:[#allocation7 + $0x308] sm:$0xff] }
  0x72   :  { %908 = vmatprep.subr.bf16.mxu1 %v2163_v63  ;;  %v2140_v63 = vcombine.low %v159_v54, %v163_v55  ;;  %v2149_v1 = vcombine.high %v167_v60, %v171_v61  ;;  %v2148_v5 = vcombine.low %v167_v60, %v171_v61  ;;  %v116_v54 = vld [vmem:[#allocation7 + $0x170] sm:$0xff]  ;;  %v2370_v55 = vld [vmem:[#allocation9 + $0xc0] ss:$8 sps:$4 sm:$0xff]  }
  0x73   :  { %v124_v60 = vld [vmem:[#allocation7 + $0x1b0] sm:$0xff] }
  0x75   :  { %909 = vmatpush1.bf16.msra.mxu1 %v2162_v0  ;;  %v2343_v0 = vld [vmem:[#allocation9 + $0x30] ss:$8 sps:$4 sm:$0xff]  }
  0x76   :  { %910 = vmatprep.subr.bf16.mxu1 %v2171_v3  ;;  %v179_v3 = vld [vmem:[#allocation7 + $0x368] sm:$0xff]  ;;  %1863 = vmatpush1.bf16.msra.mxu0 %v2343_v0  ;;  %v128_v0 = vld [vmem:[#allocation7 + $0x1d0] sm:$0xff] }
  0x77   :  { %v2157_v7 = vcombine.high %v175_v2, %v179_v3  ;;  %1864 = vmatprep.subr.bf16.mxu0 %v2344_v4  ;;  %v2156_v12 = vcombine.low %v175_v2, %v179_v3  ;;  %v2374_v2 = vld [vmem:[#allocation9 + $0xe4] ss:$8 sps:$4 sm:$0xff]   ;;  %v2376_v4 = vld [vmem:[#allocation9 + $0xe0] ss:$8 sps:$4 sm:$0xff]  }
  0x79   :  { %911 = vmatpush1.bf16.msra.mxu1 %v2170_v6  ;;  %v2346_v6 = vld [vmem:[#allocation9 + $0x40] ss:$8 sps:$4 sm:$0xff]  }
  0x7a   :  { %923 = vmatprep.subr.bf16.mxu1 %v2053_v9  ;;  %v187_v9 = vld [vmem:[#allocation7 + $0x3a8] sm:$0xff]  ;;  %1865 = vmatpush1.bf16.msra.mxu0 %v2346_v6  ;;  %v136_v6 = vld [vmem:[#allocation7 + $0x210] sm:$0xff] }
  0x7c   :  { %913 = vmatmul.mubr.bf16.vlgmr.msra.gmra.mrb[0].mxu1 %v2705_v10 }
  0x7d   :  { %924 = vmatpush1.bf16.msra.mxu1 %v2052_v11  ;;  %955 = vmatprep.mubr.bf16.mxu1 %v2702_v20  ;;  %v2347_v11 = vld [vmem:[#allocation9 + $0x54] ss:$8 sps:$4 sm:$0xff]  }
  0x7e   :  { %925 = vmatprep.subr.bf16.mxu1 %v2061_v14  ;;  %v2165_v14 = vcombine.high %v183_v8, %v187_v9  ;;  %1866 = vmatprep.subr.bf16.mxu0 %v2347_v11  ;;  %v2379_v11 = vld [vmem:[#allocation9 + $0xf0] ss:$8 sps:$4 sm:$0xff]  }
  0x7f   :  { %1867 = vmatpush1.bf16.msra.mxu0 %v2349_v13  ;;  %v144_v13 = vld [vmem:[#allocation7 + $0x250] sm:$0xff] }
  0x80   :  { %1868 = vmatprep.subr.bf16.mxu0 %v2350_v17 }
  0x81   :  { %926 = vmatpush1.bf16.msra.mxu1 %v2060_v15  ;;  %v191_v15 = vld [vmem:[#allocation7 + $0x3c8] sm:$0xff] }
  0x82   :  { %927 = vmatprep.subr.bf16.mxu1 %v2069_v18  ;;  %v2164_v18 = vcombine.low %v183_v8, %v187_v9  ;;  %v2173_v21 = vcombine.high %v191_v15, %v195_v16  ;;  %v2172_v25 = vcombine.low %v191_v15, %v195_v16  ;;  %v2377_v8 = vld [vmem:[#allocation9 + $0xf4] ss:$8 sps:$4 sm:$0xff]   ;;  %v2382_v15 = vld [vmem:[#allocation9 + $0x104] ss:$8 sps:$4 sm:$0xff]  }
  0x85   :  { %928 = vmatpush1.bf16.msra.mxu1 %v2068_v19  ;;  %v2352_v19 = vld [vmem:[#allocation9 + $0x60] ss:$8 sps:$4 sm:$0xff]  }
  0x86   :  { %929 = vmatprep.subr.bf16.mxu1 %v2077_v23  ;;  %v76_v23 = vld [vmem:[#allocation7 + $0x30] sm:$0xff]  ;;  %1869 = vmatpush1.bf16.msra.mxu0 %v2352_v19 }
  0x87   :  { %v2055_v27 = vcombine.high %v72_v22, %v76_v23  ;;  %v2054_v31 = vcombine.low %v72_v22, %v76_v23  ;;  %v156_v19 = vld [vmem:[#allocation7 + $0x2b0] sm:$0xff] }
  0x88   :  { %v160_v23 = vld [vmem:[#allocation7 + $0x2d0] sm:$0xff] }
  0x89   :  { %930 = vmatpush1.bf16.msra.mxu1 %v2076_v24  ;;  %v2353_v24 = vld [vmem:[#allocation9 + $0x74] ss:$8 sps:$4 sm:$0xff]  }
  0x8a   :  { %931 = vmatprep.subr.bf16.mxu1 %v2085_v26  ;;  %v2355_v26 = vld [vmem:[#allocation9 + $0x70] ss:$8 sps:$4 sm:$0xff]   ;;  %1870 = vmatprep.subr.bf16.mxu0 %v2353_v24 }
  0x8b   :  { %1871 = vmatpush1.bf16.msra.mxu0 %v2355_v26  ;;  %v164_v24 = vld [vmem:[#allocation7 + $0x2f0] sm:$0xff] }
  0x8c   :  { %1872 = vmatprep.subr.bf16.mxu0 %v2356_v30  ;;  %v2143_v26 = vcombine.high %v160_v23, %v164_v24 }
  0x8d   :  { %932 = vmatpush1.bf16.msra.mxu1 %v2084_v28  ;;  %v80_v28 = vld [vmem:[#allocation7 + $0x50] sm:$0xff] }
  0x8e   :  { %933 = vmatprep.subr.bf16.mxu1 %v2093_v29  ;;  %v84_v29 = vld [vmem:[#allocation7 + $0x70] sm:$0xff] }
  0x8f   :  { %v2062_v39 = vcombine.low %v80_v28, %v84_v29 }
  0x91   :  { %934 = vmatpush1.bf16.msra.mxu1 %v2092_v32  ;;  %v2358_v32 = vld [vmem:[#allocation9 + $0x80] ss:$8 sps:$4 sm:$0xff]  }
  0x92   :  { %935 = vmatprep.subr.bf16.mxu1 %v2101_v33  ;;  %v2063_v33 = vcombine.high %v80_v28, %v84_v29  ;;  %1873 = vmatpush1.bf16.msra.mxu0 %v2358_v32  ;;  %v172_v28 = vld [vmem:[#allocation7 + $0x330] sm:$0xff]  ;;  %v2142_v29 = vcombine.low %v160_v23, %v164_v24  ;;  %v161_v24 = vld [vmem:[#allocation7 + $0x2d8] sm:$0xff] }
  0x93   :  { %v180_v32 = vld [vmem:[#allocation7 + $0x370] sm:$0xff] }
  0x95   :  { %936 = vmatpush1.bf16.msra.mxu1 %v2100_v36  ;;  %v2359_v36 = vld [vmem:[#allocation9 + $0x94] ss:$8 sps:$4 sm:$0xff]  }
  0x96   :  { %937 = vmatprep.subr.bf16.mxu1 %v2109_v37  ;;  %v2361_v37 = vld [vmem:[#allocation9 + $0x90] ss:$8 sps:$4 sm:$0xff]   ;;  %1874 = vmatprep.subr.bf16.mxu0 %v2359_v36 }
  0x97   :  { %1875 = vmatpush1.bf16.msra.mxu0 %v2361_v37  ;;  %v188_v36 = vld [vmem:[#allocation7 + $0x3b0] sm:$0xff] }
  0x98   :  { %1876 = vmatprep.subr.bf16.mxu0 %v2362_v38 }
  0x99   :  { %938 = vmatpush1.bf16.msra.mxu1 %v2108_v40  ;;  %v2071_v40 = vcombine.high %v88_v34, %v92_v35 }
  0x9a   :  { %939 = vmatprep.subr.bf16.mxu1 %v2117_v41  ;;  %v96_v41 = vld [vmem:[#allocation7 + $0xd0] sm:$0xff] }
  0x9b   :  { %v2079_v46 = vcombine.high %v96_v41, %v100_v42  ;;  %1877 = vmatpush1.bf16.msra.mxu0 %v2364_v43  ;;  %v73_v43 = vld [vmem:[#allocation7 + $0x18] sm:$0xff] }
  0x9c   :  { %1878 = vmatprep.subr.bf16.mxu0 %v2365_v44  ;;  %v77_v44 = vld [vmem:[#allocation7 + $0x38] sm:$0xff] }
  0x9d   :  { %940 = vmatpush1.bf16.msra.mxu1 %v2116_v45  ;;  %v2070_v45 = vcombine.low %v88_v34, %v92_v35  ;;  %v184_v35 = vld [vmem:[#allocation7 + $0x390] sm:$0xff] }
  0x9e   :  { %941 = vmatprep.subr.bf16.mxu1 %v2125_v47  ;;  %v104_v47 = vld [vmem:[#allocation7 + $0x110] sm:$0xff]  ;;  %v2167_v38 = vcombine.high %v184_v35, %v188_v36 }
  0x9f   :  { %v2087_v52 = vcombine.high %v104_v47, %v108_v48  ;;  %1879 = vmatpush1.bf16.msra.mxu0 %v2367_v49  ;;  %v2056_v49 = vcombine.low %v73_v43, %v77_v44 }
  0xa0   :  { %1880 = vmatprep.subr.bf16.mxu0 %v2368_v50 }
  0xa1   :  { %942 = vmatpush1.bf16.msra.mxu1 %v2124_v51  ;;  %v2078_v51 = vcombine.low %v96_v41, %v100_v42  ;;  %v2166_v41 = vcombine.low %v184_v35, %v188_v36  ;;  %v185_v36 = vld [vmem:[#allocation7 + $0x398] sm:$0xff] }
  0xa2   :  { %943 = vmatprep.subr.bf16.mxu1 %v2133_v53  ;;  %v112_v53 = vld [vmem:[#allocation7 + $0x150] sm:$0xff] }
  0xa3   :  { %v2095_v58 = vcombine.high %v112_v53, %v116_v54  ;;  %1881 = vmatpush1.bf16.msra.mxu0 %v2370_v55  ;;  %v2094_v61 = vcombine.low %v112_v53, %v116_v54  ;;  %v97_v55 = vld [vmem:[#allocation7 + $0xd8] sm:$0xff] }
  0xa4   :  { %1882 = vmatprep.subr.bf16.mxu0 %v2371_v56  ;;  %v101_v56 = vld [vmem:[#allocation7 + $0xf8] sm:$0xff] }
  0xa5   :  { %944 = vmatpush1.bf16.msra.mxu1 %v2132_v57  ;;  %v2086_v57 = vcombine.low %v104_v47, %v108_v48  ;;  %v81_v47 = vld [vmem:[#allocation7 + $0x58] sm:$0xff] }
  0xa6   :  { %945 = vmatprep.subr.bf16.mxu1 %v2141_v59  ;;  %v120_v59 = vld [vmem:[#allocation7 + $0x190] sm:$0xff]  ;;  %v85_v48 = vld [vmem:[#allocation7 + $0x78] sm:$0xff] }
  0xa7   :  { %1883 = vmatpush1.bf16.msra.mxu0 %v2373_v62  ;;  %v2102_v3 = vcombine.low %v120_v59, %v124_v60  ;;  %v2065_v50 = vcombine.high %v81_v47, %v85_v48  ;;  %v2064_v53 = vcombine.low %v81_v47, %v85_v48  ;;  %v2720_v48 = vld [vmem:[%s2766_s3] sm:$0xff] }
  0xa8   :  { %1884 = vmatprep.subr.bf16.mxu0 %v2374_v2  ;;  %v121_v2 = vld [vmem:[#allocation7 + $0x198] sm:$0xff] }
  0xa9   :  { %946 = vmatpush1.bf16.msra.mxu1 %v2140_v63  ;;  %v2103_v63 = vcombine.high %v120_v59, %v124_v60  ;;  %v105_v59 = vld [vmem:[#allocation7 + $0x118] sm:$0xff] }
  0xaa   :  { %947 = vmatprep.subr.bf16.mxu1 %v2149_v1  ;;  %v132_v1 = vld [vmem:[#allocation7 + $0x1f0] sm:$0xff]  ;;  %v109_v60 = vld [vmem:[#allocation7 + $0x138] sm:$0xff] }
  0xab   :  { %1885 = vmatpush1.bf16.msra.mxu0 %v2376_v4  ;;  %v2110_v9 = vcombine.low %v128_v0, %v132_v1  ;;  %v2089_v62 = vcombine.high %v105_v59, %v109_v60 }
  0xac   :  { %1886 = vmatprep.subr.bf16.mxu0 %v2377_v8 }
  0xad   :  { %948 = vmatpush1.bf16.msra.mxu1 %v2148_v5  ;;  %v2111_v5 = vcombine.high %v128_v0, %v132_v1  ;;  %v117_v0 = vld [vmem:[#allocation7 + $0x178] sm:$0xff]  ;;  %v2088_v1 = vcombine.low %v105_v59, %v109_v60 }
  0xae   :  { %949 = vmatprep.subr.bf16.mxu1 %v2157_v7  ;;  %v140_v7 = vld [vmem:[#allocation7 + $0x230] sm:$0xff] }
  0xaf   :  { %1887 = vmatpush1.bf16.msra.mxu0 %v2379_v11  ;;  %v2118_v16 = vcombine.low %v136_v6, %v140_v7  ;;  %v137_v11 = vld [vmem:[#allocation7 + $0x218] sm:$0xff] }
  0xb0   :  { %1899 = vmatprep.subr.bf16.mxu0 %v2382_v15  ;;  %v145_v15 = vld [vmem:[#allocation7 + $0x258] sm:$0xff] }
  0xb1   :  { %950 = vmatpush1.bf16.msra.mxu1 %v2156_v12  ;;  %v2119_v12 = vcombine.high %v136_v6, %v140_v7  ;;  %v129_v6 = vld [vmem:[#allocation7 + $0x1d8] sm:$0xff] }
  0xb2   :  { %951 = vmatprep.subr.bf16.mxu1 %v2165_v14  ;;  %v148_v14 = vld [vmem:[#allocation7 + $0x270] sm:$0xff]  ;;  %v133_v7 = vld [vmem:[#allocation7 + $0x1f8] sm:$0xff] }
  0xb3   :  { %v2127_v17 = vcombine.high %v144_v13, %v148_v14 }
  0xb5   :  { %952 = vmatpush1.bf16.msra.mxu1 %v2164_v18  ;;  %v152_v18 = vld [vmem:[#allocation7 + $0x290] sm:$0xff] }
  0xb6   :  { %953 = vmatprep.subr.bf16.mxu1 %v2173_v21  ;;  %v2126_v21 = vcombine.low %v144_v13, %v148_v14  ;;  %v2135_v22 = vcombine.high %v152_v18, %v156_v19  ;;  %v2112_v13 = vcombine.low %v129_v6, %v133_v7 }
  0xb9   :  { %954 = vmatpush1.bf16.msra.mxu1 %v2172_v25  ;;  %v2134_v25 = vcombine.low %v152_v18, %v156_v19  ;;  %v153_v19 = vld [vmem:[#allocation7 + $0x298] sm:$0xff] }
  0xba   :  { %966 = vmatprep.subr.bf16.mxu1 %v2055_v27  ;;  %v168_v27 = vld [vmem:[#allocation7 + $0x310] sm:$0xff] }
  0xbb   :  { %v2151_v30 = vcombine.high %v168_v27, %v172_v28 }
  0xbc   :  { %956 = vmatmul.mubr.bf16.vlgmr.msra.gmra.mrb[4].mxu1 %v2705_v10 }
  0xbd   :  { %967 = vmatpush1.bf16.msra.mxu1 %v2054_v31  ;;  %998 = vmatprep.mubr.bf16.mxu1 %v2702_v20  ;;  %v176_v31 = vld [vmem:[#allocation7 + $0x350] sm:$0xff] }
  0xbe   :  { %968 = vmatprep.subr.bf16.mxu1 %v2063_v33  ;;  %v2150_v33 = vcombine.low %v168_v27, %v172_v28  ;;  %v2159_v34 = vcombine.high %v176_v31, %v180_v32  ;;  %v2158_v37 = vcombine.low %v176_v31, %v180_v32  ;;  %v169_v28 = vld [vmem:[#allocation7 + $0x318] sm:$0xff] }
  0xbf   :  { %v177_v32 = vld [vmem:[#allocation7 + $0x358] sm:$0xff] }
  0xc1   :  { %969 = vmatpush1.bf16.msra.mxu1 %v2062_v39  ;;  %v192_v39 = vld [vmem:[#allocation7 + $0x3d0] sm:$0xff] }
  0xc2   :  { %970 = vmatprep.subr.bf16.mxu1 %v2071_v40  ;;  %v196_v40 = vld [vmem:[#allocation7 + $0x3f0] sm:$0xff] }
  0xc3   :  { %v2175_v42 = vcombine.high %v192_v39, %v196_v40 }
  0xc5   :  { %971 = vmatpush1.bf16.msra.mxu1 %v2070_v45  ;;  %v2174_v45 = vcombine.low %v192_v39, %v196_v40  ;;  %v193_v40 = vld [vmem:[#allocation7 + $0x3d8] sm:$0xff] }
  0xc6   :  { %972 = vmatprep.subr.bf16.mxu1 %v2079_v46  ;;  %v2057_v46 = vcombine.high %v73_v43, %v77_v44 }
  0xc9   :  { %973 = vmatpush1.bf16.msra.mxu1 %v2078_v51  ;;  %v89_v51 = vld [vmem:[#allocation7 + $0x98] sm:$0xff] }
  0xca   :  { %974 = vmatprep.subr.bf16.mxu1 %v2087_v52  ;;  %v93_v52 = vld [vmem:[#allocation7 + $0xb8] sm:$0xff] }
  0xcb   :  { %v2073_v54 = vcombine.high %v89_v51, %v93_v52 }
  0xcd   :  { %975 = vmatpush1.bf16.msra.mxu1 %v2086_v57  ;;  %v2072_v57 = vcombine.low %v89_v51, %v93_v52 }
  0xce   :  { %976 = vmatprep.subr.bf16.mxu1 %v2095_v58  ;;  %v2081_v58 = vcombine.high %v97_v55, %v101_v56 }
  0xd1   :  { %977 = vmatpush1.bf16.msra.mxu1 %v2094_v61  ;;  %v2080_v61 = vcombine.low %v97_v55, %v101_v56 }
  0xd2   :  { %978 = vmatprep.subr.bf16.mxu1 %v2103_v63  ;;  %v113_v63 = vld [vmem:[#allocation7 + $0x158] sm:$0xff] }
  0xd3   :  { %v2096_v4 = vcombine.low %v113_v63, %v117_v0 }
  0xd5   :  { %979 = vmatpush1.bf16.msra.mxu1 %v2102_v3  ;;  %v125_v3 = vld [vmem:[#allocation7 + $0x1b8] sm:$0xff] }
  0xd6   :  { %980 = vmatprep.subr.bf16.mxu1 %v2111_v5  ;;  %v2105_v5 = vcombine.high %v121_v2, %v125_v3  ;;  %v2104_v8 = vcombine.low %v121_v2, %v125_v3  ;;  %v2383_v2 = vld [vmem:[#allocation9 + $0x110] ss:$8 sps:$4 sm:$0xff]   ;;  %v2388_v3 = vld [vmem:[#allocation9 + $0x124] ss:$8 sps:$4 sm:$0xff]  }
  0xd9   :  { %981 = vmatpush1.bf16.msra.mxu1 %v2110_v9  ;;  %v2113_v9 = vcombine.high %v129_v6, %v133_v7  ;;  %v2389_v6 = vld [vmem:[#allocation9 + $0x130] ss:$8 sps:$4 sm:$0xff]   ;;  %v2394_v7 = vld [vmem:[#allocation9 + $0x144] ss:$8 sps:$4 sm:$0xff]  }
  0xda   :  { %982 = vmatprep.subr.bf16.mxu1 %v2119_v12  ;;  %v141_v12 = vld [vmem:[#allocation7 + $0x238] sm:$0xff] }
  0xdb   :  { %v2121_v14 = vcombine.high %v137_v11, %v141_v12 }
  0xdd   :  { %983 = vmatpush1.bf16.msra.mxu1 %v2118_v16  ;;  %v149_v16 = vld [vmem:[#allocation7 + $0x278] sm:$0xff] }
  0xde   :  { %984 = vmatprep.subr.bf16.mxu1 %v2127_v17  ;;  %v2120_v17 = vcombine.low %v137_v11, %v141_v12  ;;  %v2129_v18 = vcombine.high %v145_v15, %v149_v16  ;;  %v2395_v11 = vld [vmem:[#allocation9 + $0x150] ss:$8 sps:$4 sm:$0xff]   ;;  %v2400_v12 = vld [vmem:[#allocation9 + $0x164] ss:$8 sps:$4 sm:$0xff]  }
  0xe1   :  { %985 = vmatpush1.bf16.msra.mxu1 %v2126_v21  ;;  %v157_v21 = vld [vmem:[#allocation7 + $0x2b8] sm:$0xff] }
  0xe2   :  { %986 = vmatprep.subr.bf16.mxu1 %v2135_v22  ;;  %v2128_v22 = vcombine.low %v145_v15, %v149_v16  ;;  %v2137_v23 = vcombine.high %v153_v19, %v157_v21  ;;  %v2401_v15 = vld [vmem:[#allocation9 + $0x170] ss:$8 sps:$4 sm:$0xff]   ;;  %v2406_v16 = vld [vmem:[#allocation9 + $0x184] ss:$8 sps:$4 sm:$0xff]  }
  0xe5   :  { %987 = vmatpush1.bf16.msra.mxu1 %v2134_v25  ;;  %v165_v25 = vld [vmem:[#allocation7 + $0x2f8] sm:$0xff] }
  0xe6   :  { %988 = vmatprep.subr.bf16.mxu1 %v2143_v26  ;;  %v2136_v26 = vcombine.low %v153_v19, %v157_v21  ;;  %v2145_v27 = vcombine.high %v161_v24, %v165_v25  ;;  %v2407_v19 = vld [vmem:[#allocation9 + $0x190] ss:$8 sps:$4 sm:$0xff]   ;;  %v2412_v21 = vld [vmem:[#allocation9 + $0x1a4] ss:$8 sps:$4 sm:$0xff]  }
  0xe9   :  { %989 = vmatpush1.bf16.msra.mxu1 %v2142_v29  ;;  %v173_v29 = vld [vmem:[#allocation7 + $0x338] sm:$0xff] }
  0xea   :  { %990 = vmatprep.subr.bf16.mxu1 %v2151_v30  ;;  %v2144_v30 = vcombine.low %v161_v24, %v165_v25  ;;  %v2153_v31 = vcombine.high %v169_v28, %v173_v29  ;;  %v2413_v24 = vld [vmem:[#allocation9 + $0x1b0] ss:$8 sps:$4 sm:$0xff]   ;;  %v2418_v25 = vld [vmem:[#allocation9 + $0x1c4] ss:$8 sps:$4 sm:$0xff]  }
  0xed   :  { %991 = vmatpush1.bf16.msra.mxu1 %v2150_v33  ;;  %v181_v33 = vld [vmem:[#allocation7 + $0x378] sm:$0xff] }
  0xee   :  { %992 = vmatprep.subr.bf16.mxu1 %v2159_v34  ;;  %v2152_v34 = vcombine.low %v169_v28, %v173_v29  ;;  %v2161_v35 = vcombine.high %v177_v32, %v181_v33 }
  0xf1   :  { %993 = vmatpush1.bf16.msra.mxu1 %v2158_v37  ;;  %v189_v37 = vld [vmem:[#allocation7 + $0x3b8] sm:$0xff] }
  0xf2   :  { %994 = vmatprep.subr.bf16.mxu1 %v2167_v38  ;;  %v2160_v38 = vcombine.low %v177_v32, %v181_v33  ;;  %v2169_v39 = vcombine.high %v185_v36, %v189_v37  ;;  %v2424_v32 = vld [vmem:[#allocation9 + $0x1e4] ss:$8 sps:$4 sm:$0xff]  }
  0xf5   :  { %995 = vmatpush1.bf16.msra.mxu1 %v2166_v41  ;;  %v197_v41 = vld [vmem:[#allocation7 + $0x3f8] sm:$0xff] }
  0xf6   :  { %996 = vmatprep.subr.bf16.mxu1 %v2175_v42  ;;  %v2168_v42 = vcombine.low %v185_v36, %v189_v37  ;;  %v2177_v43 = vcombine.high %v193_v40, %v197_v41  ;;  %v2176_v44 = vcombine.low %v193_v40, %v197_v41 }
  0xf9   :  { %997 = vmatpush1.bf16.msra.mxu1 %v2174_v45  ;;  %v200_v45 = vlaneseq }
  0xfa   :  { %1009 = vmatprep.subr.bf16.mxu1 %v2057_v46 }
  0xfb   :  { %v2714_v46 = vshrl.u32 %v200_v45, 7  ;;  %v2425_v45 = vld [vmem:[#allocation9 + $0x1f0] ss:$8 sps:$4 sm:$0xff]  }
  0xfc   :  { %999 = vmatmul.mubr.bf16.vlgmr.msra.gmra.mrb[8].mxu1 %v2705_v10 }
  0xfd   :  { %1010 = vmatpush1.bf16.msra.mxu1 %v2056_v49  ;;  %1041 = vmatprep.mubr.bf16.mxu1 %v2702_v20  ;;  %v2097_v20 = vcombine.high %v113_v63, %v117_v0  ;;  %v202_v47 = vsub.s32 0, %v2714_v46  ;;  %v206_v49 = vsub.s32 1, %v2714_v46  ;;  %v210_v28 = vsub.s32 2, %v2714_v46 }
  0xfe   :  { %1011 = vmatprep.subr.bf16.mxu1 %v2065_v50  ;;  %v214_v29 = vsub.s32 3, %v2714_v46 }
  0xff   :  { %v203_v50 = vrot.slane %v2720_v48, %v202_v47 }
 0x100   :  { %v215_v33 = vrot.slane %v2720_v48, %v214_v29 }
 0x101   :  { %1012 = vmatpush1.bf16.msra.mxu1 %v2064_v53 }
 0x102   :  { %1013 = vmatprep.subr.bf16.mxu1 %v2073_v54 }
 0x105   :  { %1014 = vmatpush1.bf16.msra.mxu1 %v2072_v57 }
 0x106   :  { %1015 = vmatprep.subr.bf16.mxu1 %v2081_v58 }
 0x109   :  { %1016 = vmatpush1.bf16.msra.mxu1 %v2080_v61 }
 0x10a   :  { %1017 = vmatprep.subr.bf16.mxu1 %v2089_v62 }
 0x10d   :  { %1018 = vmatpush1.bf16.msra.mxu1 %v2088_v1  ;;  %v2380_v1 = vld [vmem:[#allocation9 + $0x100] ss:$8 sps:$4 sm:$0xff]  }
 0x10e   :  { %1019 = vmatprep.subr.bf16.mxu1 %v2097_v20  ;;  %v2385_v20 = vld [vmem:[#allocation9 + $0x114] ss:$8 sps:$4 sm:$0xff]  }
 0x111   :  { %1020 = vmatpush1.bf16.msra.mxu1 %v2096_v4  ;;  %v2386_v4 = vld [vmem:[#allocation9 + $0x120] ss:$8 sps:$4 sm:$0xff]  }
 0x112   :  { %1021 = vmatprep.subr.bf16.mxu1 %v2105_v5  ;;  %v2391_v5 = vld [vmem:[#allocation9 + $0x134] ss:$8 sps:$4 sm:$0xff]  }
 0x115   :  { %1022 = vmatpush1.bf16.msra.mxu1 %v2104_v8  ;;  %v2392_v8 = vld [vmem:[#allocation9 + $0x140] ss:$8 sps:$4 sm:$0xff]  }
 0x116   :  { %1023 = vmatprep.subr.bf16.mxu1 %v2113_v9  ;;  %v2397_v9 = vld [vmem:[#allocation9 + $0x154] ss:$8 sps:$4 sm:$0xff]  }
 0x119   :  { %1024 = vmatpush1.bf16.msra.mxu1 %v2112_v13  ;;  %v2398_v13 = vld [vmem:[#allocation9 + $0x160] ss:$8 sps:$4 sm:$0xff]  }
 0x11a   :  { %1025 = vmatprep.subr.bf16.mxu1 %v2121_v14  ;;  %v2403_v14 = vld [vmem:[#allocation9 + $0x174] ss:$8 sps:$4 sm:$0xff]  }
 0x11d   :  { %1026 = vmatpush1.bf16.msra.mxu1 %v2120_v17  ;;  %v2404_v17 = vld [vmem:[#allocation9 + $0x180] ss:$8 sps:$4 sm:$0xff]  }
 0x11e   :  { %1027 = vmatprep.subr.bf16.mxu1 %v2129_v18  ;;  %v2409_v18 = vld [vmem:[#allocation9 + $0x194] ss:$8 sps:$4 sm:$0xff]  }
 0x121   :  { %1028 = vmatpush1.bf16.msra.mxu1 %v2128_v22  ;;  %v2410_v22 = vld [vmem:[#allocation9 + $0x1a0] ss:$8 sps:$4 sm:$0xff]  }
 0x122   :  { %1029 = vmatprep.subr.bf16.mxu1 %v2137_v23  ;;  %v2415_v23 = vld [vmem:[#allocation9 + $0x1b4] ss:$8 sps:$4 sm:$0xff]  }
 0x125   :  { %1030 = vmatpush1.bf16.msra.mxu1 %v2136_v26  ;;  %v2416_v26 = vld [vmem:[#allocation9 + $0x1c0] ss:$8 sps:$4 sm:$0xff]  }
 0x126   :  { %1031 = vmatprep.subr.bf16.mxu1 %v2145_v27  ;;  %v2421_v27 = vld [vmem:[#allocation9 + $0x1d4] ss:$8 sps:$4 sm:$0xff]  }
 0x129   :  { %1032 = vmatpush1.bf16.msra.mxu1 %v2144_v30  ;;  %v2419_v30 = vld [vmem:[#allocation9 + $0x1d0] ss:$8 sps:$4 sm:$0xff]  }
 0x12a   :  { %1033 = vmatprep.subr.bf16.mxu1 %v2153_v31  ;;  %v211_v31 = vrot.slane %v2720_v48, %v210_v28  ;;  %v2475_v28 = vld [vmem:[#allocation9 + $0x2f4] ss:$8 sps:$4 sm:$0xff]  }
 0x12d   :  { %1034 = vmatpush1.bf16.msra.mxu1 %v2152_v34 }
 0x12e   :  { %1035 = vmatprep.subr.bf16.mxu1 %v2161_v35  ;;  %v2422_v35 = vld [vmem:[#allocation9 + $0x1e0] ss:$8 sps:$4 sm:$0xff]  }
 0x131   :  { %1036 = vmatpush1.bf16.msra.mxu1 %v2160_v38  ;;  %v2427_v38 = vld [vmem:[#allocation9 + $0x1f4] ss:$8 sps:$4 sm:$0xff]  }
 0x132   :  { %1037 = vmatprep.subr.bf16.mxu1 %v2169_v39 }
 0x135   :  { %1038 = vmatpush1.bf16.msra.mxu1 %v2168_v42 }
 0x136   :  { %1039 = vmatprep.subr.bf16.mxu1 %v2177_v43 }
 0x139   :  { %1040 = vmatpush1.bf16.msra.mxu1 %v2176_v44 }
 0x13c   :  { %1042 = vmatmul.mubr.bf16.vlgmr.msra.gmra.mrb[12].mxu1 %v2705_v10  ;;  %v207_v10 = vrot.slane %v2720_v48, %v206_v49 }
 0x14f   :  { %v914_v51 = vpop.f32.mrb[0].mxu1 }
 0x150   :  { %v915_v52 = vadd.f32 %v914_v51, %v203_v50  ;;  %v916_v53 = vpop.f32.mrb[1].mxu1 }
 0x151   :  { %v917_v54 = vadd.f32 %v916_v53, %v207_v10  ;;  %v918_v55 = vpop.f32.mrb[2].mxu1 }
 0x152   :  { %v1052_v56 = vmax.f32 %v915_v52, 0.0  ;;  %v919_v57 = vadd.f32 %v918_v55, %v203_v50  ;;  %v920_v58 = vpop.f32.mrb[3].mxu1  ;;  %v2428_v55 = vld [vmem:[#allocation9 + $0x200] ss:$8 sps:$4 sm:$0xff]  }
 0x153   :  { %v921_v59 = vadd.f32 %v920_v58, %v207_v10  ;;  %v1053_v61 = vmax.f32 %v917_v54, 0.0  ;;  %v2430_v10 = vld [vmem:[#allocation9 + $0x204] ss:$8 sps:$4 sm:$0xff]  }
 0x154   :  { %v1060_v60 = vmax.f32 %v919_v57, 0.0  ;;  %v2431_v57 = vld [vmem:[#allocation9 + $0x210] ss:$8 sps:$4 sm:$0xff]   ;;  %v2436_v58 = vld [vmem:[#allocation9 + $0x224] ss:$8 sps:$4 sm:$0xff]  }
 0x155   :  { %v1061_v62 = vmax.f32 %v921_v59, 0.0  ;;  %v2434_v59 = vld [vmem:[#allocation9 + $0x220] ss:$8 sps:$4 sm:$0xff]  }
 0x156   :  { %v1068_v63 = vpack.c.bf16 %v1060_v60, %v1052_v56  ;;  %v2433_v56 = vld [vmem:[#allocation9 + $0x214] ss:$8 sps:$4 sm:$0xff]  }
 0x157   :  { %v1069_v0 = vpack.c.bf16 %v1061_v62, %v1053_v61  ;;  %v2439_v60 = vld [vmem:[#allocation9 + $0x234] ss:$8 sps:$4 sm:$0xff]   ;;  %v2437_v61 = vld [vmem:[#allocation9 + $0x230] ss:$8 sps:$4 sm:$0xff]   ;;  %v2442_v62 = vld [vmem:[#allocation9 + $0x244] ss:$8 sps:$4 sm:$0xff]  }
 0x159   :  { %1888 = vmatprep.mubr.bf16.mxu0 %v1069_v0  ;;  %v2445_v0 = vld [vmem:[#allocation9 + $0x254] ss:$8 sps:$4 sm:$0xff]  }
 0x15a   :  { %1889 = vmatmul.mubr.bf16.vlgmr.msra.gmra.mrb[0].mxu0 %v1068_v63  ;;  %v2440_v63 = vld [vmem:[#allocation9 + $0x240] ss:$8 sps:$4 sm:$0xff]  }
 0x15b   :  { %1900 = vmatpush1.bf16.msra.mxu0 %v2380_v1  ;;  %v2443_v1 = vld [vmem:[#allocation9 + $0x250] ss:$8 sps:$4 sm:$0xff]  }
 0x15c   :  { %1901 = vmatprep.subr.bf16.mxu0 %v2385_v20  ;;  %v2448_v20 = vld [vmem:[#allocation9 + $0x264] ss:$8 sps:$4 sm:$0xff]  }
 0x15f   :  { %1902 = vmatpush1.bf16.msra.mxu0 %v2383_v2  ;;  %v2446_v2 = vld [vmem:[#allocation9 + $0x260] ss:$8 sps:$4 sm:$0xff]  }
 0x160   :  { %1903 = vmatprep.subr.bf16.mxu0 %v2388_v3  ;;  %v2451_v3 = vld [vmem:[#allocation9 + $0x274] ss:$8 sps:$4 sm:$0xff]  }
 0x163   :  { %1904 = vmatpush1.bf16.msra.mxu0 %v2386_v4  ;;  %v2449_v4 = vld [vmem:[#allocation9 + $0x270] ss:$8 sps:$4 sm:$0xff]  }
 0x164   :  { %1905 = vmatprep.subr.bf16.mxu0 %v2391_v5  ;;  %v2454_v5 = vld [vmem:[#allocation9 + $0x284] ss:$8 sps:$4 sm:$0xff]  }
 0x167   :  { %1906 = vmatpush1.bf16.msra.mxu0 %v2389_v6  ;;  %v2452_v6 = vld [vmem:[#allocation9 + $0x280] ss:$8 sps:$4 sm:$0xff]  }
 0x168   :  { %1907 = vmatprep.subr.bf16.mxu0 %v2394_v7  ;;  %v2457_v7 = vld [vmem:[#allocation9 + $0x294] ss:$8 sps:$4 sm:$0xff]  }
 0x16b   :  { %1908 = vmatpush1.bf16.msra.mxu0 %v2392_v8  ;;  %v2455_v8 = vld [vmem:[#allocation9 + $0x290] ss:$8 sps:$4 sm:$0xff]  }
 0x16c   :  { %1909 = vmatprep.subr.bf16.mxu0 %v2397_v9  ;;  %v2460_v9 = vld [vmem:[#allocation9 + $0x2a4] ss:$8 sps:$4 sm:$0xff]  }
 0x16f   :  { %1910 = vmatpush1.bf16.msra.mxu0 %v2395_v11  ;;  %v2458_v11 = vld [vmem:[#allocation9 + $0x2a0] ss:$8 sps:$4 sm:$0xff]  }
 0x170   :  { %1911 = vmatprep.subr.bf16.mxu0 %v2400_v12  ;;  %v2463_v12 = vld [vmem:[#allocation9 + $0x2b4] ss:$8 sps:$4 sm:$0xff]  }
 0x173   :  { %1912 = vmatpush1.bf16.msra.mxu0 %v2398_v13  ;;  %v2461_v13 = vld [vmem:[#allocation9 + $0x2b0] ss:$8 sps:$4 sm:$0xff]  }
 0x174   :  { %1913 = vmatprep.subr.bf16.mxu0 %v2403_v14  ;;  %v2466_v14 = vld [vmem:[#allocation9 + $0x2c4] ss:$8 sps:$4 sm:$0xff]  }
 0x177   :  { %1914 = vmatpush1.bf16.msra.mxu0 %v2401_v15  ;;  %v2464_v15 = vld [vmem:[#allocation9 + $0x2c0] ss:$8 sps:$4 sm:$0xff]  }
 0x178   :  { %1915 = vmatprep.subr.bf16.mxu0 %v2406_v16  ;;  %v2469_v16 = vld [vmem:[#allocation9 + $0x2d4] ss:$8 sps:$4 sm:$0xff]  }
 0x17b   :  { %1916 = vmatpush1.bf16.msra.mxu0 %v2404_v17  ;;  %v218_v17 = vsub.s32 4, %v2714_v46 }
 0x17c   :  { %1917 = vmatprep.subr.bf16.mxu0 %v2409_v18  ;;  %v222_v18 = vsub.s32 5, %v2714_v46 }
 0x17f   :  { %1918 = vmatpush1.bf16.msra.mxu0 %v2407_v19  ;;  %v2467_v19 = vld [vmem:[#allocation9 + $0x2d0] ss:$8 sps:$4 sm:$0xff]  }
 0x180   :  { %1919 = vmatprep.subr.bf16.mxu0 %v2412_v21  ;;  %v219_v21 = vrot.slane %v2720_v48, %v218_v17  ;;  %v2523_v17 = vld [vmem:[#allocation9 + $0x3f4] ss:$8 sps:$4 sm:$0xff]  }
 0x183   :  { %1920 = vmatpush1.bf16.msra.mxu0 %v2410_v22  ;;  %v2472_v22 = vld [vmem:[#allocation9 + $0x2e4] ss:$8 sps:$4 sm:$0xff]  }
 0x184   :  { %1921 = vmatprep.subr.bf16.mxu0 %v2415_v23  ;;  %v223_v23 = vrot.slane %v2720_v48, %v222_v18 }
 0x187   :  { %1922 = vmatpush1.bf16.msra.mxu0 %v2413_v24 }
 0x188   :  { %1923 = vmatprep.subr.bf16.mxu0 %v2418_v25  ;;  %v2470_v25 = vld [vmem:[#allocation9 + $0x2e0] ss:$8 sps:$4 sm:$0xff]  }
 0x18b   :  { %1924 = vmatpush1.bf16.msra.mxu0 %v2416_v26 }
 0x18c   :  { %1925 = vmatprep.subr.bf16.mxu0 %v2421_v27 }
 0x18f   :  { %v957_v34 = vpop.f32.mrb[4].mxu1  ;;  %1926 = vmatpush1.bf16.msra.mxu0 %v2419_v30 }
 0x190   :  { %v958_v36 = vadd.f32 %v957_v34, %v211_v31  ;;  %v959_v37 = vpop.f32.mrb[5].mxu1  ;;  %1927 = vmatprep.subr.bf16.mxu0 %v2424_v32 }
 0x191   :  { %v960_v39 = vadd.f32 %v959_v37, %v215_v33  ;;  %v961_v40 = vpop.f32.mrb[6].mxu1  ;;  %v2478_v37 = vld [vmem:[#allocation9 + $0x304] ss:$8 sps:$4 sm:$0xff]  }
 0x192   :  { %v1054_v41 = vmax.f32 %v958_v36, 0.0  ;;  %v962_v42 = vadd.f32 %v961_v40, %v211_v31  ;;  %v963_v43 = vpop.f32.mrb[7].mxu1 }
 0x193   :  { %v964_v44 = vadd.f32 %v963_v43, %v215_v33  ;;  %1928 = vmatpush1.bf16.msra.mxu0 %v2422_v35  ;;  %v1055_v51 = vmax.f32 %v960_v39, 0.0  ;;  %v2473_v35 = vld [vmem:[#allocation9 + $0x2f0] ss:$8 sps:$4 sm:$0xff]   ;;  %v2481_v43 = vld [vmem:[#allocation9 + $0x314] ss:$8 sps:$4 sm:$0xff]  }
 0x194   :  { %v1062_v50 = vmax.f32 %v962_v42, 0.0  ;;  %1929 = vmatprep.subr.bf16.mxu0 %v2427_v38  ;;  %v2476_v42 = vld [vmem:[#allocation9 + $0x300] ss:$8 sps:$4 sm:$0xff]  }
 0x195   :  { %v1063_v52 = vmax.f32 %v964_v44, 0.0  ;;  %v2479_v44 = vld [vmem:[#allocation9 + $0x310] ss:$8 sps:$4 sm:$0xff]  }
 0x196   :  { %v1070_v53 = vpack.c.bf16 %v1062_v50, %v1054_v41  ;;  %v2482_v50 = vld [vmem:[#allocation9 + $0x320] ss:$8 sps:$4 sm:$0xff]  }
 0x197   :  { %v1071_v54 = vpack.c.bf16 %v1063_v52, %v1055_v51  ;;  %1930 = vmatpush1.bf16.msra.mxu0 %v2425_v45  ;;  %v2484_v45 = vld [vmem:[#allocation9 + $0x324] ss:$8 sps:$4 sm:$0xff]   ;;  %v2485_v51 = vld [vmem:[#allocation9 + $0x330] ss:$8 sps:$4 sm:$0xff]  }
 0x198   :  { %1942 = vmatprep.subr.bf16.mxu0 %v2430_v10  ;;  %v2487_v10 = vld [vmem:[#allocation9 + $0x334] ss:$8 sps:$4 sm:$0xff]   ;;  %v2490_v52 = vld [vmem:[#allocation9 + $0x344] ss:$8 sps:$4 sm:$0xff]  }
 0x199   :  { %1931 = vmatprep.mubr.bf16.mxu0 %v1071_v54  ;;  %v2493_v54 = vld [vmem:[#allocation9 + $0x354] ss:$8 sps:$4 sm:$0xff]  }
 0x19a   :  { %1932 = vmatmul.mubr.bf16.vlgmr.msra.gmra.mrb[0].mxu0 %v1070_v53  ;;  %v2488_v53 = vld [vmem:[#allocation9 + $0x340] ss:$8 sps:$4 sm:$0xff]  }
 0x19b   :  { %1943 = vmatpush1.bf16.msra.mxu0 %v2428_v55  ;;  %v2491_v55 = vld [vmem:[#allocation9 + $0x350] ss:$8 sps:$4 sm:$0xff]  }
 0x19c   :  { %1944 = vmatprep.subr.bf16.mxu0 %v2433_v56  ;;  %v2496_v56 = vld [vmem:[#allocation9 + $0x364] ss:$8 sps:$4 sm:$0xff]  }
 0x19f   :  { %1945 = vmatpush1.bf16.msra.mxu0 %v2431_v57  ;;  %v2494_v57 = vld [vmem:[#allocation9 + $0x360] ss:$8 sps:$4 sm:$0xff]  }
 0x1a0   :  { %1946 = vmatprep.subr.bf16.mxu0 %v2436_v58  ;;  %v2499_v58 = vld [vmem:[#allocation9 + $0x374] ss:$8 sps:$4 sm:$0xff]  }
 0x1a3   :  { %1947 = vmatpush1.bf16.msra.mxu0 %v2434_v59  ;;  %v2497_v59 = vld [vmem:[#allocation9 + $0x370] ss:$8 sps:$4 sm:$0xff]  }
 0x1a4   :  { %1948 = vmatprep.subr.bf16.mxu0 %v2439_v60  ;;  %v2502_v60 = vld [vmem:[#allocation9 + $0x384] ss:$8 sps:$4 sm:$0xff]  }
 0x1a7   :  { %1949 = vmatpush1.bf16.msra.mxu0 %v2437_v61  ;;  %v2500_v61 = vld [vmem:[#allocation9 + $0x380] ss:$8 sps:$4 sm:$0xff]  }
 0x1a8   :  { %1950 = vmatprep.subr.bf16.mxu0 %v2442_v62  ;;  %v2505_v62 = vld [vmem:[#allocation9 + $0x394] ss:$8 sps:$4 sm:$0xff]  }
 0x1ab   :  { %1951 = vmatpush1.bf16.msra.mxu0 %v2440_v63  ;;  %v2503_v63 = vld [vmem:[#allocation9 + $0x390] ss:$8 sps:$4 sm:$0xff]  }
 0x1ac   :  { %1952 = vmatprep.subr.bf16.mxu0 %v2445_v0  ;;  %v2508_v0 = vld [vmem:[#allocation9 + $0x3a4] ss:$8 sps:$4 sm:$0xff]  }
 0x1af   :  { %1953 = vmatpush1.bf16.msra.mxu0 %v2443_v1  ;;  %v2506_v1 = vld [vmem:[#allocation9 + $0x3a0] ss:$8 sps:$4 sm:$0xff]  }
 0x1b0   :  { %1954 = vmatprep.subr.bf16.mxu0 %v2448_v20  ;;  %v2511_v20 = vld [vmem:[#allocation9 + $0x3b4] ss:$8 sps:$4 sm:$0xff]  }
 0x1b3   :  { %1955 = vmatpush1.bf16.msra.mxu0 %v2446_v2  ;;  %v2509_v2 = vld [vmem:[#allocation9 + $0x3b0] ss:$8 sps:$4 sm:$0xff]  }
 0x1b4   :  { %1956 = vmatprep.subr.bf16.mxu0 %v2451_v3  ;;  %v2514_v3 = vld [vmem:[#allocation9 + $0x3c4] ss:$8 sps:$4 sm:$0xff]  }
 0x1b7   :  { %1957 = vmatpush1.bf16.msra.mxu0 %v2449_v4  ;;  %v2512_v4 = vld [vmem:[#allocation9 + $0x3c0] ss:$8 sps:$4 sm:$0xff]  }
 0x1b8   :  { %1958 = vmatprep.subr.bf16.mxu0 %v2454_v5  ;;  %v2517_v5 = vld [vmem:[#allocation9 + $0x3d4] ss:$8 sps:$4 sm:$0xff]  }
 0x1bb   :  { %1959 = vmatpush1.bf16.msra.mxu0 %v2452_v6  ;;  %v226_v6 = vsub.s32 6, %v2714_v46 }
 0x1bc   :  { %1960 = vmatprep.subr.bf16.mxu0 %v2457_v7  ;;  %v230_v7 = vsub.s32 7, %v2714_v46 }
 0x1bf   :  { %1961 = vmatpush1.bf16.msra.mxu0 %v2455_v8  ;;  %v2515_v8 = vld [vmem:[#allocation9 + $0x3d0] ss:$8 sps:$4 sm:$0xff]  }
 0x1c0   :  { %1962 = vmatprep.subr.bf16.mxu0 %v2460_v9  ;;  %v227_v9 = vrot.slane %v2720_v48, %v226_v6 }
 0x1c3   :  { %1963 = vmatpush1.bf16.msra.mxu0 %v2458_v11  ;;  %v2520_v11 = vld [vmem:[#allocation9 + $0x3e4] ss:$8 sps:$4 sm:$0xff]  }
 0x1c4   :  { %1964 = vmatprep.subr.bf16.mxu0 %v2463_v12  ;;  %v231_v12 = vrot.slane %v2720_v48, %v230_v7 }
 0x1c7   :  { %1965 = vmatpush1.bf16.msra.mxu0 %v2461_v13 }
 0x1c8   :  { %1966 = vmatprep.subr.bf16.mxu0 %v2466_v14  ;;  %v2518_v14 = vld [vmem:[#allocation9 + $0x3e0] ss:$8 sps:$4 sm:$0xff]  }
 0x1cb   :  { %1967 = vmatpush1.bf16.msra.mxu0 %v2464_v15 }
 0x1cc   :  { %1968 = vmatprep.subr.bf16.mxu0 %v2469_v16 }
 0x1cf   :  { %v1000_v24 = vpop.f32.mrb[8].mxu1  ;;  %1969 = vmatpush1.bf16.msra.mxu0 %v2467_v19 }
 0x1d0   :  { %v1001_v26 = vadd.f32 %v1000_v24, %v219_v21  ;;  %v1002_v27 = vpop.f32.mrb[9].mxu1  ;;  %1970 = vmatprep.subr.bf16.mxu0 %v2472_v22  ;;  %v2521_v24 = vld [vmem:[#allocation9 + $0x3f0] ss:$8 sps:$4 sm:$0xff]  }
 0x1d1   :  { %v1003_v29 = vadd.f32 %v1002_v27, %v223_v23  ;;  %v1004_v30 = vpop.f32.mrb[10].mxu1 }
 0x1d2   :  { %v1056_v31 = vmax.f32 %v1001_v26, 0.0  ;;  %v1005_v32 = vadd.f32 %v1004_v30, %v219_v21  ;;  %v1006_v33 = vpop.f32.mrb[11].mxu1  ;;  %v1204_v30 = vld [vmem:[%s2768_s5] sm:$0x3]  ;;  %s2590_s5 = scalar_lea.vmem %s2038_s14, 512 }
 0x1d3   :  { %v1007_v34 = vadd.f32 %v1006_v33, %v223_v23  ;;  %1971 = vmatpush1.bf16.msra.mxu0 %v2470_v25  ;;  %v1057_v38 = vmax.f32 %v1003_v29, 0.0  ;;  %p2591_p10 = scmp.ne.s32.totalorder %s2038_s14, %s2590_s5  ;;  %p2596_p12 = scmp.lt.s32.totalorder %s2590_s5, %s2590_s5 }
 0x1d4   :  { %v1064_v36 = vmax.f32 %v1005_v32, 0.0  ;;  %1972 = vmatprep.subr.bf16.mxu0 %v2475_v28  ;;  %v1213_v32 = vrot.slane %v1204_v30, %v206_v49 }
 0x1d5   :  { %v1065_v39 = vmax.f32 %v1007_v34, 0.0  ;;  %p2597_p13 = por %p2596_p12, %p2595_p11 }
 0x1d6   :  { %v1072_v40 = vpack.c.bf16 %v1064_v36, %v1056_v31  ;;  %v1209_v31 = vrot.slane %v1204_v30, %v202_v47 }
 0x1d7   :  { %v1073_v41 = vpack.c.bf16 %v1065_v39, %v1057_v38  ;;  %1973 = vmatpush1.bf16.msra.mxu0 %v2473_v35  ;;  %p2598_p0 = pnand %p2597_p13, %p2591_p10 }
 0x1d8   :  { %1985 = vmatprep.subr.bf16.mxu0 %v2478_v37 }
 0x1d9   :  { %1974 = vmatprep.mubr.bf16.mxu0 %v1073_v41 }
 0x1da   :  { %1975 = vmatmul.mubr.bf16.vlgmr.msra.gmra.mrb[0].mxu0 %v1072_v40 }
 0x1db   :  { %1986 = vmatpush1.bf16.msra.mxu0 %v2476_v42 }
 0x1dc   :  { %1987 = vmatprep.subr.bf16.mxu0 %v2481_v43 }
 0x1df   :  { %1988 = vmatpush1.bf16.msra.mxu0 %v2479_v44 }
 0x1e0   :  { %1989 = vmatprep.subr.bf16.mxu0 %v2484_v45 }
 0x1e3   :  { %1990 = vmatpush1.bf16.msra.mxu0 %v2482_v50 }
 0x1e4   :  { %1991 = vmatprep.subr.bf16.mxu0 %v2487_v10 }
 0x1e7   :  { %1992 = vmatpush1.bf16.msra.mxu0 %v2485_v51 }
 0x1e8   :  { %1993 = vmatprep.subr.bf16.mxu0 %v2490_v52 }
 0x1eb   :  { %1994 = vmatpush1.bf16.msra.mxu0 %v2488_v53 }
 0x1ec   :  { %1995 = vmatprep.subr.bf16.mxu0 %v2493_v54 }
 0x1ef   :  { %1996 = vmatpush1.bf16.msra.mxu0 %v2491_v55 }
 0x1f0   :  { %1997 = vmatprep.subr.bf16.mxu0 %v2496_v56 }
 0x1f3   :  { %1998 = vmatpush1.bf16.msra.mxu0 %v2494_v57 }
 0x1f4   :  { %1999 = vmatprep.subr.bf16.mxu0 %v2499_v58 }
 0x1f7   :  { %2000 = vmatpush1.bf16.msra.mxu0 %v2497_v59 }
 0x1f8   :  { %2001 = vmatprep.subr.bf16.mxu0 %v2502_v60 }
 0x1fb   :  { %2002 = vmatpush1.bf16.msra.mxu0 %v2500_v61 }
 0x1fc   :  { %2003 = vmatprep.subr.bf16.mxu0 %v2505_v62 }
 0x1ff   :  { %2004 = vmatpush1.bf16.msra.mxu0 %v2503_v63 }
 0x200   :  { %2005 = vmatprep.subr.bf16.mxu0 %v2508_v0 }
 0x203   :  { %2006 = vmatpush1.bf16.msra.mxu0 %v2506_v1 }
 0x204   :  { %2007 = vmatprep.subr.bf16.mxu0 %v2511_v20 }
 0x207   :  { %2008 = vmatpush1.bf16.msra.mxu0 %v2509_v2 }
 0x208   :  { %2009 = vmatprep.subr.bf16.mxu0 %v2514_v3 }
 0x20b   :  { %2010 = vmatpush1.bf16.msra.mxu0 %v2512_v4 }
 0x20c   :  { %2011 = vmatprep.subr.bf16.mxu0 %v2517_v5 }
 0x20f   :  { %v1043_v13 = vpop.f32.mrb[12].mxu1  ;;  %2012 = vmatpush1.bf16.msra.mxu0 %v2515_v8 }
 0x210   :  { %v1044_v15 = vadd.f32 %v1043_v13, %v227_v9  ;;  %v1045_v16 = vpop.f32.mrb[13].mxu1  ;;  %2013 = vmatprep.subr.bf16.mxu0 %v2520_v11 }
 0x211   :  { %v1046_v18 = vadd.f32 %v1045_v16, %v231_v12  ;;  %v1047_v19 = vpop.f32.mrb[14].mxu1 }
 0x212   :  { %v1048_v21 = vadd.f32 %v1047_v19, %v227_v9  ;;  %v1049_v22 = vpop.f32.mrb[15].mxu1  ;;  %v1058_v25 = vmax.f32 %v1044_v15, 0.0 }
 0x213   :  { %v1050_v23 = vadd.f32 %v1049_v22, %v231_v12  ;;  %2014 = vmatpush1.bf16.msra.mxu0 %v2518_v14  ;;  %v1059_v27 = vmax.f32 %v1046_v18, 0.0 }
 0x214   :  { %v1066_v26 = vmax.f32 %v1048_v21, 0.0  ;;  %2015 = vmatprep.subr.bf16.mxu0 %v2523_v17 }
 0x215   :  { %v1067_v28 = vmax.f32 %v1050_v23, 0.0 }
 0x216   :  { %v1074_v48 = vpack.c.bf16 %v1066_v26, %v1058_v25 }
 0x217   :  { %v1075_v29 = vpack.c.bf16 %v1067_v28, %v1059_v27  ;;  %2016 = vmatpush1.bf16.msra.mxu0 %v2521_v24 }
 0x219   :  { %2017 = vmatprep.mubr.bf16.mxu0 %v1075_v29 }
 0x21a   :  { %2018 = vmatmul.mubr.bf16.vlgmr.msra.gmra.mrb[0].mxu0 %v1074_v48 }
 0x2ed   :  { %v2019_v33 = vpop.f32.mrb[0].mxu0 }
 0x2ee   :  { %v2306_v34 = vadd.f32 %v2019_v33, %v1209_v31  ;;  %v2021_v35 = vpop.f32.mrb[1].mxu0 }
 0x2ef   :  { %v2307_v36 = vadd.f32 %v2021_v35, %v1213_v32  ;;  %v2023_v37 = vpop.f32.mrb[2].mxu0 }
 0x2f0   :  { %2028 = vst [vmem:[#allocation10] sm:$0xff] %v2306_v34  ;;  %v2308_v38 = vadd.f32 %v2023_v37, %v1209_v31  ;;  %v2025_v39 = vpop.f32.mrb[3].mxu0 }
 0x2f1   :  { %2029 = vst [vmem:[#allocation10 + $0x8] sm:$0xff] %v2307_v36  ;;  %v2309_v40 = vadd.f32 %v2025_v39, %v1213_v32 }
 0x2f2   :  { %2030 = vst [vmem:[#allocation10 + $0x10] sm:$0xff] %v2308_v38 }
 0x2f3   :  { %2031 = vst [vmem:[#allocation10 + $0x18] sm:$0xff] %v2309_v40 }
 0x2f4   :  { %2601 = shalt.err (!%p2598_p0)
}
 0x2f5   :  { %s2602_s17 = scalar_lea.hbm %s2769_s6, 512 }
 0x2f6   :  { %p2603_p1 = scmp.ne.s32.totalorder %s2769_s6, %s2602_s17  ;;  %p2606_p2 = scmp.lt.u32.totalorder %s2602_s17, %s2769_s6 }
 0x2f8   :  { %p2608_p3 = pnand %p2606_p2, %p2603_p1 }
 0x2fa   :  { %2611 = shalt.err (!%p2608_p3)
}
 0x2fb   :  { %2043 = dma.vmem_to_hbm [thread:$0]  %s2038_s14, 512, %s2769_s6, [#allocation6], %s2622_s2, %s2622_s2, %s2623_s20  }
 0x2fc   :  { %2616 = dma.done.wait [#allocation6], 512  }
 0x2fd   :  { %2617 = vsyncadd [#allocation6], 4294966784 }
 0x2fe   :  { %2047 = vsyncpa [#allocation5], 1 }
 0x2ff   :  { %2048 = vsyncpa [#allocation8], 1 }
 0x300   :  { %2049 = vsyncpa [#allocation6], 1 }

</bundles_post_ra>
